<compile_context>
chip_gen: v7x
topology: tpu7x:2x2x1
jax: 0.10.0
libtpu: 0.0.40
codegen_flags: <defaults>
</compile_context>

<pallas_src>
import functools
import numpy as np
import jax
import jax.numpy as jnp
from jax.experimental import pallas as pl
from jax.experimental.pallas import tpu as pltpu

IN_CH = 15
L_IN = 128
STRIDE = 2
OUT_F = 20
OUT_PAD = 128      # lane-dense output width (multiple of 128)
B_TILE = 8         # samples per grid step (static unroll factor, tunable)


# ----------------------------- glue helpers ---------------------------------
def _conv_out_len(lin, k, s):
    return (lin - k) // s + 1


def _adaptive_pool_matrix_np(lin, lout):
    """(lout, lin) matrix reproducing torch.nn.AdaptiveAvgPool1d semantics."""
    m = np.zeros((lout, lin), np.float32)
    for i in range(lout):
        s = (i * lin) // lout
        e = ((i + 1) * lin + lout - 1) // lout
        m[i, s:e] = 1.0 / (e - s)
    return m


def _pool_constants():
    # conv1: stride-2 output length 63 -> AdaptiveAvgPool1d(60), expressed over
    # the stride-1 conv output (length 126): odd rows get zero weight.
    l1s2 = _conv_out_len(L_IN, 3, STRIDE)           # 63
    l1s1 = L_IN - 3 + 1                             # 126
    pt1 = _adaptive_pool_matrix_np(l1s2, 60)        # (60, 63)
    pt1s = np.zeros((60, l1s1), np.float32)
    pt1s[:, 0::2] = pt1

    # conv2: stride-2 output length 29 -> AdaptiveAvgPool1d(40).  conv3 (k=1,
    # s=2) only reads the even rows of that pool, so fold both selections:
    # pt2es[i, 2t] = pt2[2i, t].
    l2s2 = _conv_out_len(60, 3, STRIDE)             # 29
    l2s1 = 60 - 3 + 1                               # 58
    pt2 = _adaptive_pool_matrix_np(l2s2, 40)        # (40, 29)
    pt2es = np.zeros((20, l2s1), np.float32)        # (20, 58)
    pt2es[:, 0::2] = pt2[0::2, :]
    return jnp.asarray(pt1s), jnp.asarray(pt2es)


# ------------------------------- kernel --------------------------------------
def tcnn_kernel(x_ref,
                wt1_ref, b1_ref, pt1s_ref,
                wt2_ref, b2_ref, pt2es_ref,
                w3_ref, b3_ref,
                w4_ref, b4_ref,
                w5_ref, b5_ref,
                wfc3_ref, wfc4_ref, wfc5_ref, bfc_ref,
                out_ref,
                v3_scr, v4_scr, v5_scr):
    mm = functools.partial(jnp.dot, preferred_element_type=jnp.float32)
    relu = lambda v: jnp.maximum(v, 0.0)
    bf16 = jnp.bfloat16
    bt = x_ref.shape[0]

    # Even-row masks for the k=1, stride-2 branches (hoisted out of the loop:
    # broadcast_in_dim is not CSE'd by JAX).
    r128 = jax.lax.broadcasted_iota(jnp.int32, (L_IN, 1), 0)
    m128 = jnp.where((r128 & 1) == 0, 1.0, 0.0)               # (128, 1) f32
    r60 = jax.lax.broadcasted_iota(jnp.int32, (60, 1), 0)
    m60 = jnp.where((r60 & 1) == 0, 1.0, 0.0)                 # (60, 1) f32

    for b in range(bt):                                       # static unroll
        xb = x_ref[b]                                         # (128, 15) bf16

        # conv1 (15->30, k=3, s=2) + ReLU, then stride-2 pick + pool(60) fused
        # into the pt1s matmul.
        y1 = relu(mm(xb[0:126, :], wt1_ref[0])
                  + mm(xb[1:127, :], wt1_ref[1])
                  + mm(xb[2:128, :], wt1_ref[2]) + b1_ref[...])   # (126, 30) f32
        x1 = mm(pt1s_ref[...], y1.astype(bf16))                   # (60, 30) f32
        x1b = x1.astype(bf16)

        # conv2 (30->60, k=3, s=2) + ReLU; pt2es also folds conv3's stride-2
        # row selection into the pool(40) matmul.
        y2 = relu(mm(x1b[0:58, :], wt2_ref[0])
                  + mm(x1b[1:59, :], wt2_ref[1])
                  + mm(x1b[2:60, :], wt2_ref[2]) + b2_ref[...])   # (58, 60) f32
        x2e = mm(pt2es_ref[...], y2.astype(bf16))                 # (20, 60) f32

        # conv3 (60->120, k=1, s=2) + ReLU + AdaptiveAvgPool1d(1)
        y3 = relu(mm(x2e.astype(bf16), w3_ref[...]) + b3_ref[...])  # (20, 120)
        v3_scr[pl.ds(b, 1), :] = jnp.mean(y3, axis=0, keepdims=True)

        # resconv1 (15->30, k=1, s=2) + ReLU + pool(1): compute every row,
        # mean over the even rows (the stride-2 positions).
        y4 = relu(mm(xb, w4_ref[...]) + b4_ref[...])                # (128, 30)
        v4_scr[pl.ds(b, 1), :] = (
            jnp.sum(y4 * m128, axis=0, keepdims=True) * (1.0 / 64.0))

        # resconv2 (30->60, k=1, s=2) + ReLU + pool(1)
        y5 = relu(mm(x1b, w5_ref[...]) + b5_ref[...])               # (60, 60)
        v5_scr[pl.ds(b, 1), :] = (
            jnp.sum(y5 * m60, axis=0, keepdims=True) * (1.0 / 30.0))

    # fc over cat([v3, v4, v5]) for the whole tile at once; fc weights are
    # zero-padded to 128 output columns -> single lane-dense store.
    out = (mm(v3_scr[...].astype(bf16), wfc3_ref[...])
           + mm(v4_scr[...].astype(bf16), wfc4_ref[...])
           + mm(v5_scr[...].astype(bf16), wfc5_ref[...])
           + bfc_ref[...])                                          # (bt, 128)
    out_ref[...] = out


# ------------------------------- wrapper --------------------------------------
def tcnn_forward_pallas(x_ncl, p, block_b=B_TILE):
    B, C, L = x_ncl.shape
    assert C == IN_CH and L == L_IN
    bf16 = jnp.bfloat16

    bt = max(1, min(block_b, B))
    b_pad = ((B + bt - 1) // bt) * bt

    x_lc = jnp.transpose(x_ncl, (0, 2, 1)).astype(bf16)         # (B, 128, 15)
    if b_pad != B:
        x_lc = jnp.pad(x_lc, ((0, b_pad - B), (0, 0), (0, 0)))

    pt1s, pt2es = _pool_constants()
    pt1s = pt1s.astype(bf16)
    pt2es = pt2es.astype(bf16)

    wt1 = jnp.transpose(p["W1"], (2, 1, 0)).astype(bf16)        # (3, 15, 30)
    wt2 = jnp.transpose(p["W2"], (2, 1, 0)).astype(bf16)        # (3, 30, 60)
    w3 = p["W3"][:, :, 0].T.astype(bf16)                        # (60, 120)
    w4 = p["W4"][:, :, 0].T.astype(bf16)                        # (15, 30)
    w5 = p["W5"][:, :, 0].T.astype(bf16)                        # (30, 60)

    wfc_pad = jnp.zeros((210, OUT_PAD), jnp.float32).at[:, :OUT_F].set(p["Wfc"].T)
    wfc3 = wfc_pad[0:120].astype(bf16)
    wfc4 = wfc_pad[120:150].astype(bf16)
    wfc5 = wfc_pad[150:210].astype(bf16)
    bfc = jnp.zeros((1, OUT_PAD), jnp.float32).at[:, :OUT_F].set(p["bfc"])

    row = lambda v: v.reshape(1, -1).astype(jnp.float32)

    operands = [
        x_lc,
        wt1, row(p["b1"]), pt1s,
        wt2, row(p["b2"]), pt2es,
        w3, row(p["b3"]),
        w4, row(p["b4"]),
        w5, row(p["b5"]),
        wfc3, wfc4, wfc5, bfc,
    ]

    def _full(shape):
        n = len(shape)
        return pl.BlockSpec(shape, lambda i, _n=n: (0,) * _n)

    in_specs = [pl.BlockSpec((bt, L_IN, IN_CH), lambda i: (i, 0, 0))]
    in_specs += [_full(op.shape) for op in operands[1:]]

    out = pl.pallas_call(
        tcnn_kernel,
        grid=(b_pad // bt,),
        in_specs=in_specs,
        out_specs=pl.BlockSpec((bt, OUT_PAD), lambda i: (i, 0)),
        out_shape=jax.ShapeDtypeStruct((b_pad, OUT_PAD), jnp.float32),
        scratch_shapes=[pltpu.VMEM((bt, 120), jnp.float32),
                        pltpu.VMEM((bt, 30), jnp.float32),
                        pltpu.VMEM((bt, 60), jnp.float32)],
        compiler_params=pltpu.CompilerParams(dimension_semantics=("parallel",)),
    )(*operands)
    return out[:B, :OUT_F]


# -------------------------- reference (plain JAX) -----------------------------
def tcnn_forward_reference(x, p):
    relu = jax.nn.relu

    def conv1d(v, w, b, stride):
        y = jax.lax.conv_general_dilated(
            v, w, window_strides=(stride,), padding="VALID",
            dimension_numbers=("NCH", "OIH", "NCH"))
        return y + b[None, :, None]

    def apool(v, lout):
        pt = jnp.asarray(_adaptive_pool_matrix_np(v.shape[-1], lout))
        return jnp.einsum("bcl,ol->bco", v, pt)

    x1 = apool(relu(conv1d(x, p["W1"], p["b1"], STRIDE)), 60)
    x2 = apool(relu(conv1d(x1, p["W2"], p["b2"], STRIDE)), 40)
    x3 = apool(relu(conv1d(x2, p["W3"], p["b3"], STRIDE)), 1)
    x4 = apool(relu(conv1d(x, p["W4"], p["b4"], STRIDE)), 1)
    x5 = apool(relu(conv1d(x1, p["W5"], p["b5"], STRIDE)), 1)
    tmp = jnp.concatenate([x3, x4, x5], axis=1)[:, :, 0]        # (B, 210)
    return tmp @ p["Wfc"].T + p["bfc"][None, :]


def init_params(key):
    ks = jax.random.split(key, 12)
    w = lambda k, s: 0.1 * jax.random.normal(k, s, jnp.float32)
    return dict(
        W1=w(ks[0], (30, 15, 3)),  b1=w(ks[1], (30,)),
        W2=w(ks[2], (60, 30, 3)),  b2=w(ks[3], (60,)),
        W3=w(ks[4], (120, 60, 1)), b3=w(ks[5], (120,)),
        W4=w(ks[6], (30, 15, 1)),  b4=w(ks[7], (30,)),
        W5=w(ks[8], (60, 30, 1)),  b5=w(ks[9], (60,)),
        Wfc=w(ks[10], (20, 210)),  bfc=w(ks[11], (20,)),
    )


if __name__ == "__main__":
    key = jax.random.PRNGKey(0)
    pkey, xkey = jax.random.split(key)
    params = init_params(pkey)
    x = jax.random.normal(xkey, (2, IN_CH, L_IN), jnp.float32)   # NCL like PyTorch

    out = jax.block_until_ready(tcnn_forward_pallas(x, params))
    assert out.shape == (2, OUT_F)

    ref = jax.block_until_ready(tcnn_forward_reference(x, params))
    if not np.allclose(np.asarray(out), np.asarray(ref), rtol=2e-2, atol=1e-2):
        diff = float(np.max(np.abs(np.asarray(out) - np.asarray(ref))))
        raise AssertionError(f"Pallas output mismatch vs JAX reference (max abs diff {diff})")

    print("KERNEL_OK")
</pallas_src>

<mosaic_0001>
module attributes {stable_mosaic.version = 11 : i64} {
  func.func @tcnn_kernel(%arg0: i32, %arg1: memref<2x128x15xbf16, #tpu.memory_space<vmem>>, %arg2: memref<3x15x30xbf16, #tpu.memory_space<vmem>>, %arg3: memref<1x30xf32, #tpu.memory_space<vmem>>, %arg4: memref<60x126xbf16, #tpu.memory_space<vmem>>, %arg5: memref<3x30x60xbf16, #tpu.memory_space<vmem>>, %arg6: memref<1x60xf32, #tpu.memory_space<vmem>>, %arg7: memref<20x58xbf16, #tpu.memory_space<vmem>>, %arg8: memref<60x120xbf16, #tpu.memory_space<vmem>>, %arg9: memref<1x120xf32, #tpu.memory_space<vmem>>, %arg10: memref<15x30xbf16, #tpu.memory_space<vmem>>, %arg11: memref<1x30xf32, #tpu.memory_space<vmem>>, %arg12: memref<30x60xbf16, #tpu.memory_space<vmem>>, %arg13: memref<1x60xf32, #tpu.memory_space<vmem>>, %arg14: memref<120x128xbf16, #tpu.memory_space<vmem>>, %arg15: memref<30x128xbf16, #tpu.memory_space<vmem>>, %arg16: memref<60x128xbf16, #tpu.memory_space<vmem>>, %arg17: memref<1x128xf32, #tpu.memory_space<vmem>>, %arg18: memref<2x128xf32, #tpu.memory_space<vmem>>, %arg19: memref<2x120xf32, #tpu.memory_space<vmem>>, %arg20: memref<2x30xf32, #tpu.memory_space<vmem>>, %arg21: memref<2x60xf32, #tpu.memory_space<vmem>>) attributes {dimension_semantics = [#tpu.dimension_semantics<parallel>], iteration_bounds = array<i64: 1>, scalar_prefetch = 0 : i64, scratch_operands = 3 : i64, tpu.core_type = #tpu.core_type<tc>, window_params = [{transform_indices = @transform_0, window_bounds = array<i64: 2, 128, 15>}, {pipeline_mode = #tpu.pipeline_mode<synchronous>, transform_indices = @transform_1, window_bounds = array<i64: 3, 15, 30>}, {pipeline_mode = #tpu.pipeline_mode<synchronous>, transform_indices = @transform_2, window_bounds = array<i64: 1, 30>}, {pipeline_mode = #tpu.pipeline_mode<synchronous>, transform_indices = @transform_3, window_bounds = array<i64: 60, 126>}, {pipeline_mode = #tpu.pipeline_mode<synchronous>, transform_indices = @transform_4, window_bounds = array<i64: 3, 30, 60>}, {pipeline_mode = #tpu.pipeline_mode<synchronous>, transform_indices = @transform_5, window_bounds = array<i64: 1, 60>}, {pipeline_mode = #tpu.pipeline_mode<synchronous>, transform_indices = @transform_6, window_bounds = array<i64: 20, 58>}, {pipeline_mode = #tpu.pipeline_mode<synchronous>, transform_indices = @transform_7, window_bounds = array<i64: 60, 120>}, {pipeline_mode = #tpu.pipeline_mode<synchronous>, transform_indices = @transform_8, window_bounds = array<i64: 1, 120>}, {pipeline_mode = #tpu.pipeline_mode<synchronous>, transform_indices = @transform_9, window_bounds = array<i64: 15, 30>}, {pipeline_mode = #tpu.pipeline_mode<synchronous>, transform_indices = @transform_10, window_bounds = array<i64: 1, 30>}, {pipeline_mode = #tpu.pipeline_mode<synchronous>, transform_indices = @transform_11, window_bounds = array<i64: 30, 60>}, {pipeline_mode = #tpu.pipeline_mode<synchronous>, transform_indices = @transform_12, window_bounds = array<i64: 1, 60>}, {pipeline_mode = #tpu.pipeline_mode<synchronous>, transform_indices = @transform_13, window_bounds = array<i64: 120, 128>}, {pipeline_mode = #tpu.pipeline_mode<synchronous>, transform_indices = @transform_14, window_bounds = array<i64: 30, 128>}, {pipeline_mode = #tpu.pipeline_mode<synchronous>, transform_indices = @transform_15, window_bounds = array<i64: 60, 128>}, {pipeline_mode = #tpu.pipeline_mode<synchronous>, transform_indices = @transform_16, window_bounds = array<i64: 1, 128>}, {transform_indices = @transform_17, window_bounds = array<i64: 2, 128>}]} {
    %0 = tpu.iota {dimensions = array<i32: 0>} : vector<128x1xi32>
    %c1_i32 = arith.constant 1 : i32
    %1 = vector.broadcast %c1_i32 : i32 to vector<128x1xi32>
    %2 = arith.andi %0, %1 : vector<128x1xi32>
    %c0_i32 = arith.constant 0 : i32
    %3 = vector.broadcast %c0_i32 : i32 to vector<128x1xi32>
    %4 = arith.cmpi eq, %2, %3 : vector<128x1xi32>
    %cst = arith.constant 1.000000e+00 : f32
    %cst_0 = arith.constant 0.000000e+00 : f32
    %5 = vector.broadcast %cst : f32 to vector<128x1xf32>
    %6 = vector.broadcast %cst_0 : f32 to vector<128x1xf32>
    %7 = arith.select %4, %5, %6 : vector<128x1xi1>, vector<128x1xf32>
    %8 = tpu.iota {dimensions = array<i32: 0>} : vector<60x1xi32>
    %c1_i32_1 = arith.constant 1 : i32
    %9 = vector.broadcast %c1_i32_1 : i32 to vector<60x1xi32>
    %10 = arith.andi %8, %9 : vector<60x1xi32>
    %c0_i32_2 = arith.constant 0 : i32
    %11 = vector.broadcast %c0_i32_2 : i32 to vector<60x1xi32>
    %12 = arith.cmpi eq, %10, %11 : vector<60x1xi32>
    %cst_3 = arith.constant 1.000000e+00 : f32
    %cst_4 = arith.constant 0.000000e+00 : f32
    %13 = vector.broadcast %cst_3 : f32 to vector<60x1xf32>
    %14 = vector.broadcast %cst_4 : f32 to vector<60x1xf32>
    %15 = arith.select %12, %13, %14 : vector<60x1xi1>, vector<60x1xf32>
    %c0 = arith.constant 0 : index
    %c0_5 = arith.constant 0 : index
    %c0_6 = arith.constant 0 : index
    %16 = vector.load %arg1[%c0, %c0_5, %c0_6] : memref<2x128x15xbf16, #tpu.memory_space<vmem>>, vector<1x128x15xbf16>
    %17 = vector.shape_cast %16 : vector<1x128x15xbf16> to vector<128x15xbf16>
    %18 = vector.extract_strided_slice %17 {offsets = [0, 0], sizes = [126, 15], strides = [1, 1]} : vector<128x15xbf16> to vector<126x15xbf16>
    %c0_7 = arith.constant 0 : index
    %c0_8 = arith.constant 0 : index
    %c0_9 = arith.constant 0 : index
    %19 = vector.load %arg2[%c0_7, %c0_8, %c0_9] : memref<3x15x30xbf16, #tpu.memory_space<vmem>>, vector<1x15x30xbf16>
    %20 = vector.shape_cast %19 : vector<1x15x30xbf16> to vector<15x30xbf16>
    %cst_10 = arith.constant dense<0.000000e+00> : vector<126x30xf32>
    %21 = tpu.matmul %18, %20, %cst_10 {dimension_numbers = #tpu.dot_dimension_numbers<[1], [0], [0], [1], [0, 0, 1, 1], [], []>} : vector<126x15xbf16>, vector<15x30xbf16>, vector<126x30xf32> -> vector<126x30xf32>
    %22 = vector.extract_strided_slice %17 {offsets = [1, 0], sizes = [126, 15], strides = [1, 1]} : vector<128x15xbf16> to vector<126x15xbf16>
    %c1 = arith.constant 1 : index
    %c0_11 = arith.constant 0 : index
    %c0_12 = arith.constant 0 : index
    %23 = vector.load %arg2[%c1, %c0_11, %c0_12] : memref<3x15x30xbf16, #tpu.memory_space<vmem>>, vector<1x15x30xbf16>
    %24 = vector.shape_cast %23 : vector<1x15x30xbf16> to vector<15x30xbf16>
    %cst_13 = arith.constant dense<0.000000e+00> : vector<126x30xf32>
    %25 = tpu.matmul %22, %24, %cst_13 {dimension_numbers = #tpu.dot_dimension_numbers<[1], [0], [0], [1], [0, 0, 1, 1], [], []>} : vector<126x15xbf16>, vector<15x30xbf16>, vector<126x30xf32> -> vector<126x30xf32>
    %26 = arith.addf %21, %25 : vector<126x30xf32>
    %27 = vector.extract_strided_slice %17 {offsets = [2, 0], sizes = [126, 15], strides = [1, 1]} : vector<128x15xbf16> to vector<126x15xbf16>
    %c2 = arith.constant 2 : index
    %c0_14 = arith.constant 0 : index
    %c0_15 = arith.constant 0 : index
    %28 = vector.load %arg2[%c2, %c0_14, %c0_15] : memref<3x15x30xbf16, #tpu.memory_space<vmem>>, vector<1x15x30xbf16>
    %29 = vector.shape_cast %28 : vector<1x15x30xbf16> to vector<15x30xbf16>
    %cst_16 = arith.constant dense<0.000000e+00> : vector<126x30xf32>
    %30 = tpu.matmul %27, %29, %cst_16 {dimension_numbers = #tpu.dot_dimension_numbers<[1], [0], [0], [1], [0, 0, 1, 1], [], []>} : vector<126x15xbf16>, vector<15x30xbf16>, vector<126x30xf32> -> vector<126x30xf32>
    %31 = arith.addf %26, %30 : vector<126x30xf32>
    %c0_17 = arith.constant 0 : index
    %c0_18 = arith.constant 0 : index
    %32 = vector.load %arg3[%c0_17, %c0_18] : memref<1x30xf32, #tpu.memory_space<vmem>>, vector<1x30xf32>
    %33 = vector.broadcast %32 : vector<1x30xf32> to vector<126x30xf32>
    %34 = arith.addf %31, %33 : vector<126x30xf32>
    %cst_19 = arith.constant 0.000000e+00 : f32
    %35 = vector.broadcast %cst_19 : f32 to vector<126x30xf32>
    %36 = arith.maximumf %34, %35 : vector<126x30xf32>
    %c0_20 = arith.constant 0 : index
    %c0_21 = arith.constant 0 : index
    %37 = vector.load %arg4[%c0_20, %c0_21] : memref<60x126xbf16, #tpu.memory_space<vmem>>, vector<60x126xbf16>
    %38 = arith.truncf %36 : vector<126x30xf32> to vector<126x30xbf16>
    %cst_22 = arith.constant dense<0.000000e+00> : vector<60x30xf32>
    %39 = tpu.matmul %37, %38, %cst_22 {dimension_numbers = #tpu.dot_dimension_numbers<[1], [0], [0], [1], [0, 0, 1, 1], [], []>} : vector<60x126xbf16>, vector<126x30xbf16>, vector<60x30xf32> -> vector<60x30xf32>
    %40 = arith.truncf %39 : vector<60x30xf32> to vector<60x30xbf16>
    %41 = vector.extract_strided_slice %40 {offsets = [0, 0], sizes = [58, 30], strides = [1, 1]} : vector<60x30xbf16> to vector<58x30xbf16>
    %c0_23 = arith.constant 0 : index
    %c0_24 = arith.constant 0 : index
    %c0_25 = arith.constant 0 : index
    %42 = vector.load %arg5[%c0_23, %c0_24, %c0_25] : memref<3x30x60xbf16, #tpu.memory_space<vmem>>, vector<1x30x60xbf16>
    %43 = vector.shape_cast %42 : vector<1x30x60xbf16> to vector<30x60xbf16>
    %cst_26 = arith.constant dense<0.000000e+00> : vector<58x60xf32>
    %44 = tpu.matmul %41, %43, %cst_26 {dimension_numbers = #tpu.dot_dimension_numbers<[1], [0], [0], [1], [0, 0, 1, 1], [], []>} : vector<58x30xbf16>, vector<30x60xbf16>, vector<58x60xf32> -> vector<58x60xf32>
    %45 = vector.extract_strided_slice %40 {offsets = [1, 0], sizes = [58, 30], strides = [1, 1]} : vector<60x30xbf16> to vector<58x30xbf16>
    %c1_27 = arith.constant 1 : index
    %c0_28 = arith.constant 0 : index
    %c0_29 = arith.constant 0 : index
    %46 = vector.load %arg5[%c1_27, %c0_28, %c0_29] : memref<3x30x60xbf16, #tpu.memory_space<vmem>>, vector<1x30x60xbf16>
    %47 = vector.shape_cast %46 : vector<1x30x60xbf16> to vector<30x60xbf16>
    %cst_30 = arith.constant dense<0.000000e+00> : vector<58x60xf32>
    %48 = tpu.matmul %45, %47, %cst_30 {dimension_numbers = #tpu.dot_dimension_numbers<[1], [0], [0], [1], [0, 0, 1, 1], [], []>} : vector<58x30xbf16>, vector<30x60xbf16>, vector<58x60xf32> -> vector<58x60xf32>
    %49 = arith.addf %44, %48 : vector<58x60xf32>
    %50 = vector.extract_strided_slice %40 {offsets = [2, 0], sizes = [58, 30], strides = [1, 1]} : vector<60x30xbf16> to vector<58x30xbf16>
    %c2_31 = arith.constant 2 : index
    %c0_32 = arith.constant 0 : index
    %c0_33 = arith.constant 0 : index
    %51 = vector.load %arg5[%c2_31, %c0_32, %c0_33] : memref<3x30x60xbf16, #tpu.memory_space<vmem>>, vector<1x30x60xbf16>
    %52 = vector.shape_cast %51 : vector<1x30x60xbf16> to vector<30x60xbf16>
    %cst_34 = arith.constant dense<0.000000e+00> : vector<58x60xf32>
    %53 = tpu.matmul %50, %52, %cst_34 {dimension_numbers = #tpu.dot_dimension_numbers<[1], [0], [0], [1], [0, 0, 1, 1], [], []>} : vector<58x30xbf16>, vector<30x60xbf16>, vector<58x60xf32> -> vector<58x60xf32>
    %54 = arith.addf %49, %53 : vector<58x60xf32>
    %c0_35 = arith.constant 0 : index
    %c0_36 = arith.constant 0 : index
    %55 = vector.load %arg6[%c0_35, %c0_36] : memref<1x60xf32, #tpu.memory_space<vmem>>, vector<1x60xf32>
    %56 = vector.broadcast %55 : vector<1x60xf32> to vector<58x60xf32>
    %57 = arith.addf %54, %56 : vector<58x60xf32>
    %cst_37 = arith.constant 0.000000e+00 : f32
    %58 = vector.broadcast %cst_37 : f32 to vector<58x60xf32>
    %59 = arith.maximumf %57, %58 : vector<58x60xf32>
    %c0_38 = arith.constant 0 : index
    %c0_39 = arith.constant 0 : index
    %60 = vector.load %arg7[%c0_38, %c0_39] : memref<20x58xbf16, #tpu.memory_space<vmem>>, vector<20x58xbf16>
    %61 = arith.truncf %59 : vector<58x60xf32> to vector<58x60xbf16>
    %cst_40 = arith.constant dense<0.000000e+00> : vector<20x60xf32>
    %62 = tpu.matmul %60, %61, %cst_40 {dimension_numbers = #tpu.dot_dimension_numbers<[1], [0], [0], [1], [0, 0, 1, 1], [], []>} : vector<20x58xbf16>, vector<58x60xbf16>, vector<20x60xf32> -> vector<20x60xf32>
    %63 = arith.truncf %62 : vector<20x60xf32> to vector<20x60xbf16>
    %c0_41 = arith.constant 0 : index
    %c0_42 = arith.constant 0 : index
    %64 = vector.load %arg8[%c0_41, %c0_42] : memref<60x120xbf16, #tpu.memory_space<vmem>>, vector<60x120xbf16>
    %cst_43 = arith.constant dense<0.000000e+00> : vector<20x120xf32>
    %65 = tpu.matmul %63, %64, %cst_43 {dimension_numbers = #tpu.dot_dimension_numbers<[1], [0], [0], [1], [0, 0, 1, 1], [], []>} : vector<20x60xbf16>, vector<60x120xbf16>, vector<20x120xf32> -> vector<20x120xf32>
    %c0_44 = arith.constant 0 : index
    %c0_45 = arith.constant 0 : index
    %66 = vector.load %arg9[%c0_44, %c0_45] : memref<1x120xf32, #tpu.memory_space<vmem>>, vector<1x120xf32>
    %67 = vector.broadcast %66 : vector<1x120xf32> to vector<20x120xf32>
    %68 = arith.addf %65, %67 : vector<20x120xf32>
    %cst_46 = arith.constant 0.000000e+00 : f32
    %69 = vector.broadcast %cst_46 : f32 to vector<20x120xf32>
    %70 = arith.maximumf %68, %69 : vector<20x120xf32>
    %cst_47 = arith.constant dense<0.000000e+00> : vector<120xf32>
    %71 = vector.multi_reduction <add>, %70, %cst_47 [0] : vector<20x120xf32> to vector<120xf32>
    %72 = vector.shape_cast %71 : vector<120xf32> to vector<1x120xf32>
    %cst_48 = arith.constant 2.000000e+01 : f32
    %73 = vector.broadcast %cst_48 : f32 to vector<1x120xf32>
    %74 = arith.divf %72, %73 : vector<1x120xf32>
    %c0_49 = arith.constant 0 : index
    %c0_50 = arith.constant 0 : index
    %75 = vector.load %arg19[%c0_49, %c0_50] : memref<2x120xf32, #tpu.memory_space<vmem>>, vector<1x120xf32>
    tpu.vector_store %arg19[%c0_49, %c0_50], %74 {strides = array<i32>} : memref<2x120xf32, #tpu.memory_space<vmem>>, vector<1x120xf32>,
    %c0_51 = arith.constant 0 : index
    %c0_52 = arith.constant 0 : index
    %76 = vector.load %arg10[%c0_51, %c0_52] : memref<15x30xbf16, #tpu.memory_space<vmem>>, vector<15x30xbf16>
    %cst_53 = arith.constant dense<0.000000e+00> : vector<128x30xf32>
    %77 = tpu.matmul %17, %76, %cst_53 {dimension_numbers = #tpu.dot_dimension_numbers<[1], [0], [0], [1], [0, 0, 1, 1], [], []>} : vector<128x15xbf16>, vector<15x30xbf16>, vector<128x30xf32> -> vector<128x30xf32>
    %c0_54 = arith.constant 0 : index
    %c0_55 = arith.constant 0 : index
    %78 = vector.load %arg11[%c0_54, %c0_55] : memref<1x30xf32, #tpu.memory_space<vmem>>, vector<1x30xf32>
    %79 = vector.broadcast %78 : vector<1x30xf32> to vector<128x30xf32>
    %80 = arith.addf %77, %79 : vector<128x30xf32>
    %cst_56 = arith.constant 0.000000e+00 : f32
    %81 = vector.broadcast %cst_56 : f32 to vector<128x30xf32>
    %82 = arith.maximumf %80, %81 : vector<128x30xf32>
    %83 = vector.broadcast %7 : vector<128x1xf32> to vector<128x30xf32>
    %84 = arith.mulf %82, %83 : vector<128x30xf32>
    %cst_57 = arith.constant dense<0.000000e+00> : vector<30xf32>
    %85 = vector.multi_reduction <add>, %84, %cst_57 [0] : vector<128x30xf32> to vector<30xf32>
    %86 = vector.shape_cast %85 : vector<30xf32> to vector<1x30xf32>
    %cst_58 = arith.constant 1.562500e-02 : f32
    %87 = vector.broadcast %cst_58 : f32 to vector<1x30xf32>
    %88 = arith.mulf %86, %87 : vector<1x30xf32>
    %c0_59 = arith.constant 0 : index
    %c0_60 = arith.constant 0 : index
    %89 = vector.load %arg20[%c0_59, %c0_60] : memref<2x30xf32, #tpu.memory_space<vmem>>, vector<1x30xf32>
    tpu.vector_store %arg20[%c0_59, %c0_60], %88 {strides = array<i32>} : memref<2x30xf32, #tpu.memory_space<vmem>>, vector<1x30xf32>,
    %c0_61 = arith.constant 0 : index
    %c0_62 = arith.constant 0 : index
    %90 = vector.load %arg12[%c0_61, %c0_62] : memref<30x60xbf16, #tpu.memory_space<vmem>>, vector<30x60xbf16>
    %cst_63 = arith.constant dense<0.000000e+00> : vector<60x60xf32>
    %91 = tpu.matmul %40, %90, %cst_63 {dimension_numbers = #tpu.dot_dimension_numbers<[1], [0], [0], [1], [0, 0, 1, 1], [], []>} : vector<60x30xbf16>, vector<30x60xbf16>, vector<60x60xf32> -> vector<60x60xf32>
    %c0_64 = arith.constant 0 : index
    %c0_65 = arith.constant 0 : index
    %92 = vector.load %arg13[%c0_64, %c0_65] : memref<1x60xf32, #tpu.memory_space<vmem>>, vector<1x60xf32>
    %93 = vector.broadcast %92 : vector<1x60xf32> to vector<60x60xf32>
    %94 = arith.addf %91, %93 : vector<60x60xf32>
    %cst_66 = arith.constant 0.000000e+00 : f32
    %95 = vector.broadcast %cst_66 : f32 to vector<60x60xf32>
    %96 = arith.maximumf %94, %95 : vector<60x60xf32>
    %97 = vector.broadcast %15 : vector<60x1xf32> to vector<60x60xf32>
    %98 = arith.mulf %96, %97 : vector<60x60xf32>
    %cst_67 = arith.constant dense<0.000000e+00> : vector<60xf32>
    %99 = vector.multi_reduction <add>, %98, %cst_67 [0] : vector<60x60xf32> to vector<60xf32>
    %100 = vector.shape_cast %99 : vector<60xf32> to vector<1x60xf32>
    %cst_68 = arith.constant 0.0333333351 : f32
    %101 = vector.broadcast %cst_68 : f32 to vector<1x60xf32>
    %102 = arith.mulf %100, %101 : vector<1x60xf32>
    %c0_69 = arith.constant 0 : index
    %c0_70 = arith.constant 0 : index
    %103 = vector.load %arg21[%c0_69, %c0_70] : memref<2x60xf32, #tpu.memory_space<vmem>>, vector<1x60xf32>
    tpu.vector_store %arg21[%c0_69, %c0_70], %102 {strides = array<i32>} : memref<2x60xf32, #tpu.memory_space<vmem>>, vector<1x60xf32>,
    %c1_71 = arith.constant 1 : index
    %c0_72 = arith.constant 0 : index
    %c0_73 = arith.constant 0 : index
    %104 = vector.load %arg1[%c1_71, %c0_72, %c0_73] : memref<2x128x15xbf16, #tpu.memory_space<vmem>>, vector<1x128x15xbf16>
    %105 = vector.shape_cast %104 : vector<1x128x15xbf16> to vector<128x15xbf16>
    %106 = vector.extract_strided_slice %105 {offsets = [0, 0], sizes = [126, 15], strides = [1, 1]} : vector<128x15xbf16> to vector<126x15xbf16>
    %c0_74 = arith.constant 0 : index
    %c0_75 = arith.constant 0 : index
    %c0_76 = arith.constant 0 : index
    %107 = vector.load %arg2[%c0_74, %c0_75, %c0_76] : memref<3x15x30xbf16, #tpu.memory_space<vmem>>, vector<1x15x30xbf16>
    %108 = vector.shape_cast %107 : vector<1x15x30xbf16> to vector<15x30xbf16>
    %cst_77 = arith.constant dense<0.000000e+00> : vector<126x30xf32>
    %109 = tpu.matmul %106, %108, %cst_77 {dimension_numbers = #tpu.dot_dimension_numbers<[1], [0], [0], [1], [0, 0, 1, 1], [], []>} : vector<126x15xbf16>, vector<15x30xbf16>, vector<126x30xf32> -> vector<126x30xf32>
    %110 = vector.extract_strided_slice %105 {offsets = [1, 0], sizes = [126, 15], strides = [1, 1]} : vector<128x15xbf16> to vector<126x15xbf16>
    %c1_78 = arith.constant 1 : index
    %c0_79 = arith.constant 0 : index
    %c0_80 = arith.constant 0 : index
    %111 = vector.load %arg2[%c1_78, %c0_79, %c0_80] : memref<3x15x30xbf16, #tpu.memory_space<vmem>>, vector<1x15x30xbf16>
    %112 = vector.shape_cast %111 : vector<1x15x30xbf16> to vector<15x30xbf16>
    %cst_81 = arith.constant dense<0.000000e+00> : vector<126x30xf32>
    %113 = tpu.matmul %110, %112, %cst_81 {dimension_numbers = #tpu.dot_dimension_numbers<[1], [0], [0], [1], [0, 0, 1, 1], [], []>} : vector<126x15xbf16>, vector<15x30xbf16>, vector<126x30xf32> -> vector<126x30xf32>
    %114 = arith.addf %109, %113 : vector<126x30xf32>
    %115 = vector.extract_strided_slice %105 {offsets = [2, 0], sizes = [126, 15], strides = [1, 1]} : vector<128x15xbf16> to vector<126x15xbf16>
    %c2_82 = arith.constant 2 : index
    %c0_83 = arith.constant 0 : index
    %c0_84 = arith.constant 0 : index
    %116 = vector.load %arg2[%c2_82, %c0_83, %c0_84] : memref<3x15x30xbf16, #tpu.memory_space<vmem>>, vector<1x15x30xbf16>
    %117 = vector.shape_cast %116 : vector<1x15x30xbf16> to vector<15x30xbf16>
    %cst_85 = arith.constant dense<0.000000e+00> : vector<126x30xf32>
    %118 = tpu.matmul %115, %117, %cst_85 {dimension_numbers = #tpu.dot_dimension_numbers<[1], [0], [0], [1], [0, 0, 1, 1], [], []>} : vector<126x15xbf16>, vector<15x30xbf16>, vector<126x30xf32> -> vector<126x30xf32>
    %119 = arith.addf %114, %118 : vector<126x30xf32>
    %c0_86 = arith.constant 0 : index
    %c0_87 = arith.constant 0 : index
    %120 = vector.load %arg3[%c0_86, %c0_87] : memref<1x30xf32, #tpu.memory_space<vmem>>, vector<1x30xf32>
    %121 = vector.broadcast %120 : vector<1x30xf32> to vector<126x30xf32>
    %122 = arith.addf %119, %121 : vector<126x30xf32>
    %cst_88 = arith.constant 0.000000e+00 : f32
    %123 = vector.broadcast %cst_88 : f32 to vector<126x30xf32>
    %124 = arith.maximumf %122, %123 : vector<126x30xf32>
    %c0_89 = arith.constant 0 : index
    %c0_90 = arith.constant 0 : index
    %125 = vector.load %arg4[%c0_89, %c0_90] : memref<60x126xbf16, #tpu.memory_space<vmem>>, vector<60x126xbf16>
    %126 = arith.truncf %124 : vector<126x30xf32> to vector<126x30xbf16>
    %cst_91 = arith.constant dense<0.000000e+00> : vector<60x30xf32>
    %127 = tpu.matmul %125, %126, %cst_91 {dimension_numbers = #tpu.dot_dimension_numbers<[1], [0], [0], [1], [0, 0, 1, 1], [], []>} : vector<60x126xbf16>, vector<126x30xbf16>, vector<60x30xf32> -> vector<60x30xf32>
    %128 = arith.truncf %127 : vector<60x30xf32> to vector<60x30xbf16>
    %129 = vector.extract_strided_slice %128 {offsets = [0, 0], sizes = [58, 30], strides = [1, 1]} : vector<60x30xbf16> to vector<58x30xbf16>
    %c0_92 = arith.constant 0 : index
    %c0_93 = arith.constant 0 : index
    %c0_94 = arith.constant 0 : index
    %130 = vector.load %arg5[%c0_92, %c0_93, %c0_94] : memref<3x30x60xbf16, #tpu.memory_space<vmem>>, vector<1x30x60xbf16>
    %131 = vector.shape_cast %130 : vector<1x30x60xbf16> to vector<30x60xbf16>
    %cst_95 = arith.constant dense<0.000000e+00> : vector<58x60xf32>
    %132 = tpu.matmul %129, %131, %cst_95 {dimension_numbers = #tpu.dot_dimension_numbers<[1], [0], [0], [1], [0, 0, 1, 1], [], []>} : vector<58x30xbf16>, vector<30x60xbf16>, vector<58x60xf32> -> vector<58x60xf32>
    %133 = vector.extract_strided_slice %128 {offsets = [1, 0], sizes = [58, 30], strides = [1, 1]} : vector<60x30xbf16> to vector<58x30xbf16>
    %c1_96 = arith.constant 1 : index
    %c0_97 = arith.constant 0 : index
    %c0_98 = arith.constant 0 : index
    %134 = vector.load %arg5[%c1_96, %c0_97, %c0_98] : memref<3x30x60xbf16, #tpu.memory_space<vmem>>, vector<1x30x60xbf16>
    %135 = vector.shape_cast %134 : vector<1x30x60xbf16> to vector<30x60xbf16>
    %cst_99 = arith.constant dense<0.000000e+00> : vector<58x60xf32>
    %136 = tpu.matmul %133, %135, %cst_99 {dimension_numbers = #tpu.dot_dimension_numbers<[1], [0], [0], [1], [0, 0, 1, 1], [], []>} : vector<58x30xbf16>, vector<30x60xbf16>, vector<58x60xf32> -> vector<58x60xf32>
    %137 = arith.addf %132, %136 : vector<58x60xf32>
    %138 = vector.extract_strided_slice %128 {offsets = [2, 0], sizes = [58, 30], strides = [1, 1]} : vector<60x30xbf16> to vector<58x30xbf16>
    %c2_100 = arith.constant 2 : index
    %c0_101 = arith.constant 0 : index
    %c0_102 = arith.constant 0 : index
    %139 = vector.load %arg5[%c2_100, %c0_101, %c0_102] : memref<3x30x60xbf16, #tpu.memory_space<vmem>>, vector<1x30x60xbf16>
    %140 = vector.shape_cast %139 : vector<1x30x60xbf16> to vector<30x60xbf16>
    %cst_103 = arith.constant dense<0.000000e+00> : vector<58x60xf32>
    %141 = tpu.matmul %138, %140, %cst_103 {dimension_numbers = #tpu.dot_dimension_numbers<[1], [0], [0], [1], [0, 0, 1, 1], [], []>} : vector<58x30xbf16>, vector<30x60xbf16>, vector<58x60xf32> -> vector<58x60xf32>
    %142 = arith.addf %137, %141 : vector<58x60xf32>
    %c0_104 = arith.constant 0 : index
    %c0_105 = arith.constant 0 : index
    %143 = vector.load %arg6[%c0_104, %c0_105] : memref<1x60xf32, #tpu.memory_space<vmem>>, vector<1x60xf32>
    %144 = vector.broadcast %143 : vector<1x60xf32> to vector<58x60xf32>
    %145 = arith.addf %142, %144 : vector<58x60xf32>
    %cst_106 = arith.constant 0.000000e+00 : f32
    %146 = vector.broadcast %cst_106 : f32 to vector<58x60xf32>
    %147 = arith.maximumf %145, %146 : vector<58x60xf32>
    %c0_107 = arith.constant 0 : index
    %c0_108 = arith.constant 0 : index
    %148 = vector.load %arg7[%c0_107, %c0_108] : memref<20x58xbf16, #tpu.memory_space<vmem>>, vector<20x58xbf16>
    %149 = arith.truncf %147 : vector<58x60xf32> to vector<58x60xbf16>
    %cst_109 = arith.constant dense<0.000000e+00> : vector<20x60xf32>
    %150 = tpu.matmul %148, %149, %cst_109 {dimension_numbers = #tpu.dot_dimension_numbers<[1], [0], [0], [1], [0, 0, 1, 1], [], []>} : vector<20x58xbf16>, vector<58x60xbf16>, vector<20x60xf32> -> vector<20x60xf32>
    %151 = arith.truncf %150 : vector<20x60xf32> to vector<20x60xbf16>
    %c0_110 = arith.constant 0 : index
    %c0_111 = arith.constant 0 : index
    %152 = vector.load %arg8[%c0_110, %c0_111] : memref<60x120xbf16, #tpu.memory_space<vmem>>, vector<60x120xbf16>
    %cst_112 = arith.constant dense<0.000000e+00> : vector<20x120xf32>
    %153 = tpu.matmul %151, %152, %cst_112 {dimension_numbers = #tpu.dot_dimension_numbers<[1], [0], [0], [1], [0, 0, 1, 1], [], []>} : vector<20x60xbf16>, vector<60x120xbf16>, vector<20x120xf32> -> vector<20x120xf32>
    %c0_113 = arith.constant 0 : index
    %c0_114 = arith.constant 0 : index
    %154 = vector.load %arg9[%c0_113, %c0_114] : memref<1x120xf32, #tpu.memory_space<vmem>>, vector<1x120xf32>
    %155 = vector.broadcast %154 : vector<1x120xf32> to vector<20x120xf32>
    %156 = arith.addf %153, %155 : vector<20x120xf32>
    %cst_115 = arith.constant 0.000000e+00 : f32
    %157 = vector.broadcast %cst_115 : f32 to vector<20x120xf32>
    %158 = arith.maximumf %156, %157 : vector<20x120xf32>
    %cst_116 = arith.constant dense<0.000000e+00> : vector<120xf32>
    %159 = vector.multi_reduction <add>, %158, %cst_116 [0] : vector<20x120xf32> to vector<120xf32>
    %160 = vector.shape_cast %159 : vector<120xf32> to vector<1x120xf32>
    %cst_117 = arith.constant 2.000000e+01 : f32
    %161 = vector.broadcast %cst_117 : f32 to vector<1x120xf32>
    %162 = arith.divf %160, %161 : vector<1x120xf32>
    %c1_118 = arith.constant 1 : index
    %c0_119 = arith.constant 0 : index
    %163 = vector.load %arg19[%c1_118, %c0_119] : memref<2x120xf32, #tpu.memory_space<vmem>>, vector<1x120xf32>
    tpu.vector_store %arg19[%c1_118, %c0_119], %162 {strides = array<i32>} : memref<2x120xf32, #tpu.memory_space<vmem>>, vector<1x120xf32>,
    %c0_120 = arith.constant 0 : index
    %c0_121 = arith.constant 0 : index
    %164 = vector.load %arg10[%c0_120, %c0_121] : memref<15x30xbf16, #tpu.memory_space<vmem>>, vector<15x30xbf16>
    %cst_122 = arith.constant dense<0.000000e+00> : vector<128x30xf32>
    %165 = tpu.matmul %105, %164, %cst_122 {dimension_numbers = #tpu.dot_dimension_numbers<[1], [0], [0], [1], [0, 0, 1, 1], [], []>} : vector<128x15xbf16>, vector<15x30xbf16>, vector<128x30xf32> -> vector<128x30xf32>
    %c0_123 = arith.constant 0 : index
    %c0_124 = arith.constant 0 : index
    %166 = vector.load %arg11[%c0_123, %c0_124] : memref<1x30xf32, #tpu.memory_space<vmem>>, vector<1x30xf32>
    %167 = vector.broadcast %166 : vector<1x30xf32> to vector<128x30xf32>
    %168 = arith.addf %165, %167 : vector<128x30xf32>
    %cst_125 = arith.constant 0.000000e+00 : f32
    %169 = vector.broadcast %cst_125 : f32 to vector<128x30xf32>
    %170 = arith.maximumf %168, %169 : vector<128x30xf32>
    %171 = vector.broadcast %7 : vector<128x1xf32> to vector<128x30xf32>
    %172 = arith.mulf %170, %171 : vector<128x30xf32>
    %cst_126 = arith.constant dense<0.000000e+00> : vector<30xf32>
    %173 = vector.multi_reduction <add>, %172, %cst_126 [0] : vector<128x30xf32> to vector<30xf32>
    %174 = vector.shape_cast %173 : vector<30xf32> to vector<1x30xf32>
    %cst_127 = arith.constant 1.562500e-02 : f32
    %175 = vector.broadcast %cst_127 : f32 to vector<1x30xf32>
    %176 = arith.mulf %174, %175 : vector<1x30xf32>
    %c1_128 = arith.constant 1 : index
    %c0_129 = arith.constant 0 : index
    %177 = vector.load %arg20[%c1_128, %c0_129] : memref<2x30xf32, #tpu.memory_space<vmem>>, vector<1x30xf32>
    tpu.vector_store %arg20[%c1_128, %c0_129], %176 {strides = array<i32>} : memref<2x30xf32, #tpu.memory_space<vmem>>, vector<1x30xf32>,
    %c0_130 = arith.constant 0 : index
    %c0_131 = arith.constant 0 : index
    %178 = vector.load %arg12[%c0_130, %c0_131] : memref<30x60xbf16, #tpu.memory_space<vmem>>, vector<30x60xbf16>
    %cst_132 = arith.constant dense<0.000000e+00> : vector<60x60xf32>
    %179 = tpu.matmul %128, %178, %cst_132 {dimension_numbers = #tpu.dot_dimension_numbers<[1], [0], [0], [1], [0, 0, 1, 1], [], []>} : vector<60x30xbf16>, vector<30x60xbf16>, vector<60x60xf32> -> vector<60x60xf32>
    %c0_133 = arith.constant 0 : index
    %c0_134 = arith.constant 0 : index
    %180 = vector.load %arg13[%c0_133, %c0_134] : memref<1x60xf32, #tpu.memory_space<vmem>>, vector<1x60xf32>
    %181 = vector.broadcast %180 : vector<1x60xf32> to vector<60x60xf32>
    %182 = arith.addf %179, %181 : vector<60x60xf32>
    %cst_135 = arith.constant 0.000000e+00 : f32
    %183 = vector.broadcast %cst_135 : f32 to vector<60x60xf32>
    %184 = arith.maximumf %182, %183 : vector<60x60xf32>
    %185 = vector.broadcast %15 : vector<60x1xf32> to vector<60x60xf32>
    %186 = arith.mulf %184, %185 : vector<60x60xf32>
    %cst_136 = arith.constant dense<0.000000e+00> : vector<60xf32>
    %187 = vector.multi_reduction <add>, %186, %cst_136 [0] : vector<60x60xf32> to vector<60xf32>
    %188 = vector.shape_cast %187 : vector<60xf32> to vector<1x60xf32>
    %cst_137 = arith.constant 0.0333333351 : f32
    %189 = vector.broadcast %cst_137 : f32 to vector<1x60xf32>
    %190 = arith.mulf %188, %189 : vector<1x60xf32>
    %c1_138 = arith.constant 1 : index
    %c0_139 = arith.constant 0 : index
    %191 = vector.load %arg21[%c1_138, %c0_139] : memref<2x60xf32, #tpu.memory_space<vmem>>, vector<1x60xf32>
    tpu.vector_store %arg21[%c1_138, %c0_139], %190 {strides = array<i32>} : memref<2x60xf32, #tpu.memory_space<vmem>>, vector<1x60xf32>,
    %c0_140 = arith.constant 0 : index
    %c0_141 = arith.constant 0 : index
    %192 = vector.load %arg19[%c0_140, %c0_141] : memref<2x120xf32, #tpu.memory_space<vmem>>, vector<2x120xf32>
    %193 = arith.truncf %192 : vector<2x120xf32> to vector<2x120xbf16>
    %c0_142 = arith.constant 0 : index
    %c0_143 = arith.constant 0 : index
    %194 = vector.load %arg14[%c0_142, %c0_143] : memref<120x128xbf16, #tpu.memory_space<vmem>>, vector<120x128xbf16>
    %cst_144 = arith.constant dense<0.000000e+00> : vector<2x128xf32>
    %195 = tpu.matmul %193, %194, %cst_144 {dimension_numbers = #tpu.dot_dimension_numbers<[1], [0], [0], [1], [0, 0, 1, 1], [], []>} : vector<2x120xbf16>, vector<120x128xbf16>, vector<2x128xf32> -> vector<2x128xf32>
    %c0_145 = arith.constant 0 : index
    %c0_146 = arith.constant 0 : index
    %196 = vector.load %arg20[%c0_145, %c0_146] : memref<2x30xf32, #tpu.memory_space<vmem>>, vector<2x30xf32>
    %197 = arith.truncf %196 : vector<2x30xf32> to vector<2x30xbf16>
    %c0_147 = arith.constant 0 : index
    %c0_148 = arith.constant 0 : index
    %198 = vector.load %arg15[%c0_147, %c0_148] : memref<30x128xbf16, #tpu.memory_space<vmem>>, vector<30x128xbf16>
    %cst_149 = arith.constant dense<0.000000e+00> : vector<2x128xf32>
    %199 = tpu.matmul %197, %198, %cst_149 {dimension_numbers = #tpu.dot_dimension_numbers<[1], [0], [0], [1], [0, 0, 1, 1], [], []>} : vector<2x30xbf16>, vector<30x128xbf16>, vector<2x128xf32> -> vector<2x128xf32>
    %200 = arith.addf %195, %199 : vector<2x128xf32>
    %c0_150 = arith.constant 0 : index
    %c0_151 = arith.constant 0 : index
    %201 = vector.load %arg21[%c0_150, %c0_151] : memref<2x60xf32, #tpu.memory_space<vmem>>, vector<2x60xf32>
    %202 = arith.truncf %201 : vector<2x60xf32> to vector<2x60xbf16>
    %c0_152 = arith.constant 0 : index
    %c0_153 = arith.constant 0 : index
    %203 = vector.load %arg16[%c0_152, %c0_153] : memref<60x128xbf16, #tpu.memory_space<vmem>>, vector<60x128xbf16>
    %cst_154 = arith.constant dense<0.000000e+00> : vector<2x128xf32>
    %204 = tpu.matmul %202, %203, %cst_154 {dimension_numbers = #tpu.dot_dimension_numbers<[1], [0], [0], [1], [0, 0, 1, 1], [], []>} : vector<2x60xbf16>, vector<60x128xbf16>, vector<2x128xf32> -> vector<2x128xf32>
    %205 = arith.addf %200, %204 : vector<2x128xf32>
    %c0_155 = arith.constant 0 : index
    %c0_156 = arith.constant 0 : index
    %206 = vector.load %arg17[%c0_155, %c0_156] : memref<1x128xf32, #tpu.memory_space<vmem>>, vector<1x128xf32>
    %207 = vector.broadcast %206 : vector<1x128xf32> to vector<2x128xf32>
    %208 = arith.addf %205, %207 : vector<2x128xf32>
    %c0_157 = arith.constant 0 : index
    %c0_158 = arith.constant 0 : index
    %209 = vector.load %arg18[%c0_157, %c0_158] : memref<2x128xf32, #tpu.memory_space<vmem>>, vector<2x128xf32>
    tpu.vector_store %arg18[%c0_157, %c0_158], %208 {strides = array<i32>} : memref<2x128xf32, #tpu.memory_space<vmem>>, vector<2x128xf32>,
    return
  }
  func.func @transform_0(%arg0: i32) -> (i32, i32, i32) {
    %c0_i32 = arith.constant 0 : i32
    %c0_i32_0 = arith.constant 0 : i32
    %c0_i32_1 = arith.constant 0 : i32
    return %arg0, %c0_i32, %c0_i32_0 : i32, i32, i32
  }
  func.func @transform_1(%arg0: i32) -> (i32, i32, i32) {
    %c0_i32 = arith.constant 0 : i32
    %c0_i32_0 = arith.constant 0 : i32
    %c0_i32_1 = arith.constant 0 : i32
    %c0_i32_2 = arith.constant 0 : i32
    return %c0_i32, %c0_i32_0, %c0_i32_1 : i32, i32, i32
  }
  func.func @transform_2(%arg0: i32) -> (i32, i32) {
    %c0_i32 = arith.constant 0 : i32
    %c0_i32_0 = arith.constant 0 : i32
    %c0_i32_1 = arith.constant 0 : i32
    return %c0_i32, %c0_i32_0 : i32, i32
  }
  func.func @transform_3(%arg0: i32) -> (i32, i32) {
    %c0_i32 = arith.constant 0 : i32
    %c0_i32_0 = arith.constant 0 : i32
    %c0_i32_1 = arith.constant 0 : i32
    return %c0_i32, %c0_i32_0 : i32, i32
  }
  func.func @transform_4(%arg0: i32) -> (i32, i32, i32) {
    %c0_i32 = arith.constant 0 : i32
    %c0_i32_0 = arith.constant 0 : i32
    %c0_i32_1 = arith.constant 0 : i32
    %c0_i32_2 = arith.constant 0 : i32
    return %c0_i32, %c0_i32_0, %c0_i32_1 : i32, i32, i32
  }
  func.func @transform_5(%arg0: i32) -> (i32, i32) {
    %c0_i32 = arith.constant 0 : i32
    %c0_i32_0 = arith.constant 0 : i32
    %c0_i32_1 = arith.constant 0 : i32
    return %c0_i32, %c0_i32_0 : i32, i32
  }
  func.func @transform_6(%arg0: i32) -> (i32, i32) {
    %c0_i32 = arith.constant 0 : i32
    %c0_i32_0 = arith.constant 0 : i32
    %c0_i32_1 = arith.constant 0 : i32
    return %c0_i32, %c0_i32_0 : i32, i32
  }
  func.func @transform_7(%arg0: i32) -> (i32, i32) {
    %c0_i32 = arith.constant 0 : i32
    %c0_i32_0 = arith.constant 0 : i32
    %c0_i32_1 = arith.constant 0 : i32
    return %c0_i32, %c0_i32_0 : i32, i32
  }
  func.func @transform_8(%arg0: i32) -> (i32, i32) {
    %c0_i32 = arith.constant 0 : i32
    %c0_i32_0 = arith.constant 0 : i32
    %c0_i32_1 = arith.constant 0 : i32
    return %c0_i32, %c0_i32_0 : i32, i32
  }
  func.func @transform_9(%arg0: i32) -> (i32, i32) {
    %c0_i32 = arith.constant 0 : i32
    %c0_i32_0 = arith.constant 0 : i32
    %c0_i32_1 = arith.constant 0 : i32
    return %c0_i32, %c0_i32_0 : i32, i32
  }
  func.func @transform_10(%arg0: i32) -> (i32, i32) {
    %c0_i32 = arith.constant 0 : i32
    %c0_i32_0 = arith.constant 0 : i32
    %c0_i32_1 = arith.constant 0 : i32
    return %c0_i32, %c0_i32_0 : i32, i32
  }
  func.func @transform_11(%arg0: i32) -> (i32, i32) {
    %c0_i32 = arith.constant 0 : i32
    %c0_i32_0 = arith.constant 0 : i32
    %c0_i32_1 = arith.constant 0 : i32
    return %c0_i32, %c0_i32_0 : i32, i32
  }
  func.func @transform_12(%arg0: i32) -> (i32, i32) {
    %c0_i32 = arith.constant 0 : i32
    %c0_i32_0 = arith.constant 0 : i32
    %c0_i32_1 = arith.constant 0 : i32
    return %c0_i32, %c0_i32_0 : i32, i32
  }
  func.func @transform_13(%arg0: i32) -> (i32, i32) {
    %c0_i32 = arith.constant 0 : i32
    %c0_i32_0 = arith.constant 0 : i32
    %c0_i32_1 = arith.constant 0 : i32
    return %c0_i32, %c0_i32_0 : i32, i32
  }
  func.func @transform_14(%arg0: i32) -> (i32, i32) {
    %c0_i32 = arith.constant 0 : i32
    %c0_i32_0 = arith.constant 0 : i32
    %c0_i32_1 = arith.constant 0 : i32
    return %c0_i32, %c0_i32_0 : i32, i32
  }
  func.func @transform_15(%arg0: i32) -> (i32, i32) {
    %c0_i32 = arith.constant 0 : i32
    %c0_i32_0 = arith.constant 0 : i32
    %c0_i32_1 = arith.constant 0 : i32
    return %c0_i32, %c0_i32_0 : i32, i32
  }
  func.func @transform_16(%arg0: i32) -> (i32, i32) {
    %c0_i32 = arith.constant 0 : i32
    %c0_i32_0 = arith.constant 0 : i32
    %c0_i32_1 = arith.constant 0 : i32
    return %c0_i32, %c0_i32_0 : i32, i32
  }
  func.func @transform_17(%arg0: i32) -> (i32, i32) {
    %c0_i32 = arith.constant 0 : i32
    %c0_i32_0 = arith.constant 0 : i32
    return %arg0, %c0_i32 : i32, i32
  }
}

</mosaic_0001>

<bundles_post_ra>
// kernel: tpu_custom_call.1
= control target key start
LH: loop header
LB: loop body
LE: loop exit
PB: predicated region body
PF: predicated region fallthrough
CT: control target
= control target key end

     0   :  { %s5981_s0 = inlined_call_operand.vmem [shape: bf16[2,128,15], index: 0, kind: input, shape index: {}]   ;;  %s5982_s1 = inlined_call_operand.hbm [shape: bf16[3,15,30], index: 1, kind: input, shape index: {}]   ;;  %s5983_s2 = inlined_call_operand.hbm [shape: f32[1,30], index: 2, kind: input, shape index: {}]   ;;  %s5984_s3 = inlined_call_operand.vmem [shape: bf16[60,126], index: 3, kind: input, shape index: {}]   ;;  %s5985_s4 = inlined_call_operand.vmem [shape: bf16[3,30,60], index: 4, kind: input, shape index: {}]   ;;  %s5986_s5 = inlined_call_operand.hbm [shape: f32[1,60], index: 5, kind: input, shape index: {}]   ;;  %s5987_s6 = inlined_call_operand.hbm [shape: bf16[20,58], index: 6, kind: input, shape index: {}]   ;;  %s5988_s7 = inlined_call_operand.hbm [shape: bf16[60,120], index: 7, kind: input, shape index: {}]   ;;  %s5989_s8 = inlined_call_operand.hbm [shape: f32[1,120], index: 8, kind: input, shape index: {}]   ;;  %s5990_s9 = inlined_call_operand.hbm [shape: bf16[15,30], index: 9, kind: input, shape index: {}]   ;;  %s5991_s10 = inlined_call_operand.hbm [shape: f32[1,30], index: 10, kind: input, shape index: {}]   ;;  %s5992_s11 = inlined_call_operand.hbm [shape: bf16[30,60], index: 11, kind: input, shape index: {}]   ;;  %s5993_s12 = inlined_call_operand.hbm [shape: f32[1,60], index: 12, kind: input, shape index: {}]   ;;  %s5994_s13 = inlined_call_operand.vmem [shape: bf16[120,128], index: 13, kind: input, shape index: {}]   ;;  %s5995_s14 = inlined_call_operand.vmem [shape: bf16[30,128], index: 14, kind: input, shape index: {}]   ;;  %s5996_s15 = inlined_call_operand.vmem [shape: bf16[60,128], index: 15, kind: input, shape index: {}]   ;;  %s5997_s16 = inlined_call_operand.vmem [shape: f32[1,128], index: 16, kind: input, shape index: {}]   ;;  %s5998_s17 = inlined_call_operand.hbm [shape: f32[2,128], index: 17, kind: output, shape index: {}]  }
   0x1   :  { %6002 = sst [smem:[#allocation30_spill]] %s5981_s0 }
   0x2   :  { %6003 = sst [smem:[#allocation31_spill]] %s5982_s1 }
   0x3   :  { %22 = vsyncpa [#allocation6], 0 }
   0x4   :  { %23 = vsyncpa [#allocation9], 0 }
   0x5   :  { %24 = vsyncpa [#allocation12], 0 }
   0x6   :  { %25 = vsyncpa [#allocation15], 0 }
   0x7   :  { %26 = vsyncpa [#allocation18], 0 }
   0x8   :  { %27 = vsyncpa [#allocation21], 0 }
   0x9   :  { %28 = vsyncpa [#allocation7], 0  ;;  %s4905_s24 = smov [#allocation8]   ;;  %s4649_s28 = scalar_lea.hbm %s5983_s2, 16 }
   0xa   :  { %s49_s25 = sshll.u32 %s4905_s24, 4  ;;  %p4650_p0 = scmp.ne.s32.totalorder %s5983_s2, %s4649_s28  ;;  %s50_s25 = int_to_ptr.vmem [resolvable:$true] %s49_s25 }
   0xb   :  { %p4653_p1 = scmp.lt.u32.totalorder %s4649_s28, %s5983_s2 }
   0xd   :  { %p4655_p2 = pnand %p4653_p1, %p4650_p0 }
   0xf   :  { %4658 = shalt.err (!%p4655_p2)
}
  0x10   :  { %s4659_s19 = scalar_lea.vmem %s50_s25, 16  ;;  %s4663_s1 = scalar_lea.vmem %s50_s25, 32 }
  0x11   :  { %p4660_p3 = scmp.ne.s32.totalorder %s50_s25, %s4659_s19  ;;  %p4664_p4 = scmp.lt.s32.totalorder %s50_s25, %s50_s25 }
  0x12   :  { %p4665_p5 = scmp.lt.s32.totalorder %s4663_s1, %s4659_s19 }
  0x14   :  { %p4666_p6 = por %p4665_p5, %p4664_p4 }
  0x16   :  { %p4667_p7 = pnand %p4666_p6, %p4660_p3 }
  0x18   :  { %4670 = shalt.err (!%p4667_p7)
}
  0x19   :  { %52 = dma.hbm_to_vmem [thread:$0]  %s5983_s2, 16, %s50_s25, [#allocation9]  }
  0x1a   :  { %s4906_s22 = smov [#allocation11]   ;;  %s4907_s24 = smov [#allocation14]  }
  0x1b   :  { %s72_s23 = sshll.u32 %s4906_s22, 4  ;;  %s97_s26 = sshll.u32 %s4907_s24, 4  ;;  %s73_s23 = int_to_ptr.vmem [resolvable:$true] %s72_s23  ;;  %s98_s26 = int_to_ptr.vmem [resolvable:$true] %s97_s26 }
  0x1c   :  { %s4671_s29 = scalar_lea.hbm %s5987_s6, 192 }
  0x1d   :  { %p4672_p8 = scmp.ne.s32.totalorder %s5987_s6, %s4671_s29  ;;  %p4675_p9 = scmp.lt.u32.totalorder %s4671_s29, %s5987_s6 }
  0x1f   :  { %p4677_p10 = pnand %p4675_p9, %p4672_p8 }
  0x21   :  { %4680 = shalt.err (!%p4677_p10)
}
  0x22   :  { %s4681_s2 = scalar_lea.vmem %s73_s23, 192  ;;  %p4686_p12 = scmp.lt.s32.totalorder %s73_s23, %s73_s23 }
  0x23   :  { %p4682_p11 = scmp.ne.s32.totalorder %s73_s23, %s4681_s2  ;;  %p4687_p13 = scmp.lt.s32.totalorder %s4681_s2, %s4681_s2 }
  0x25   :  { %p4688_p0 = por %p4687_p13, %p4686_p12 }
  0x27   :  { %p4689_p1 = pnand %p4688_p0, %p4682_p11 }
  0x29   :  { %4692 = shalt.err (!%p4689_p1)
}
  0x2a   :  { %s4908_s25 = smov 64   ;;  %s4909_s1 = smov 4  }
  0x2b   :  { %78 = dma.hbm_to_vmem [thread:$0]  %s5987_s6, 192, %s73_s23, [#allocation12], %s4908_s25, %s4908_s25, %s4909_s1  }
  0x2c   :  { %s4693_s27 = scalar_lea.hbm %s5989_s8, 16 }
  0x2d   :  { %p4694_p2 = scmp.ne.s32.totalorder %s5989_s8, %s4693_s27  ;;  %p4697_p3 = scmp.lt.u32.totalorder %s4693_s27, %s5989_s8 }
  0x2f   :  { %p4699_p4 = pnand %p4697_p3, %p4694_p2 }
  0x31   :  { %4702 = shalt.err (!%p4699_p4)
}
  0x32   :  { %s4703_s18 = scalar_lea.vmem %s98_s26, 16  ;;  %s4707_s19 = scalar_lea.vmem %s98_s26, 32 }
  0x33   :  { %p4704_p5 = scmp.ne.s32.totalorder %s98_s26, %s4703_s18  ;;  %p4708_p6 = scmp.lt.s32.totalorder %s98_s26, %s98_s26 }
  0x34   :  { %p4709_p7 = scmp.lt.s32.totalorder %s4707_s19, %s4703_s18 }
  0x36   :  { %p4710_p8 = por %p4709_p7, %p4708_p6 }
  0x38   :  { %p4711_p9 = pnand %p4710_p8, %p4704_p5 }
  0x3a   :  { %4714 = shalt.err (!%p4711_p9)
}
  0x3b   :  { %100 = dma.hbm_to_vmem [thread:$0]  %s5989_s8, 16, %s98_s26, [#allocation15]  }
  0x3c   :  { %s4910_s2 = smov [#allocation17]   ;;  %s4911_s21 = smov [#allocation5]  }
  0x3d   :  { %s119_s20 = sshll.u32 %s4910_s2, 4  ;;  %s36_s22 = sshll.u32 %s4911_s21, 4  ;;  %s120_s20 = int_to_ptr.vmem [resolvable:$true] %s119_s20  ;;  %s37_s22 = int_to_ptr.vmem [resolvable:$true] %s36_s22 }
  0x3e   :  { %s4715_s28 = scalar_lea.hbm %s5991_s10, 16 }
  0x3f   :  { %p4716_p10 = scmp.ne.s32.totalorder %s5991_s10, %s4715_s28  ;;  %p4719_p11 = scmp.lt.u32.totalorder %s4715_s28, %s5991_s10 }
  0x41   :  { %p4721_p12 = pnand %p4719_p11, %p4716_p10 }
  0x43   :  { %4724 = shalt.err (!%p4721_p12)
}
  0x44   :  { %s4725_s8 = scalar_lea.vmem %s120_s20, 16  ;;  %s4729_s26 = scalar_lea.vmem %s120_s20, 32 }
  0x45   :  { %p4726_p13 = scmp.ne.s32.totalorder %s120_s20, %s4725_s8  ;;  %p4730_p0 = scmp.lt.s32.totalorder %s120_s20, %s120_s20 }
  0x46   :  { %p4731_p1 = scmp.lt.s32.totalorder %s4729_s26, %s4725_s8 }
  0x48   :  { %p4732_p2 = por %p4731_p1, %p4730_p0 }
  0x4a   :  { %p4733_p3 = pnand %p4732_p2, %p4726_p13 }
  0x4c   :  { %4736 = shalt.err (!%p4733_p3)
}
  0x4d   :  { %122 = dma.hbm_to_vmem [thread:$0]  %s5991_s10, 16, %s120_s20, [#allocation18]  }
  0x4e   :  { %s6004_s21 = sld [smem:[#allocation31_spill]] }
  0x54   :  { %s4737_s24 = scalar_lea.hbm %s6004_s21, 384 }
  0x55   :  { %p4738_p4 = scmp.ne.s32.totalorder %s6004_s21, %s4737_s24  ;;  %p4741_p5 = scmp.lt.u32.totalorder %s4737_s24, %s6004_s21 }
  0x57   :  { %p4743_p6 = pnand %p4741_p5, %p4738_p4 }
  0x59   :  { %4746 = shalt.err (!%p4743_p6)
}
  0x5a   :  { %s4747_s30 = scalar_lea.vmem %s37_s22, 384  ;;  %p4752_p8 = scmp.lt.s32.totalorder %s37_s22, %s37_s22 }
  0x5b   :  { %p4748_p7 = scmp.ne.s32.totalorder %s37_s22, %s4747_s30  ;;  %p4753_p9 = scmp.lt.s32.totalorder %s4747_s30, %s4747_s30 }
  0x5d   :  { %p4754_p10 = por %p4753_p9, %p4752_p8 }
  0x5f   :  { %p4755_p11 = pnand %p4754_p10, %p4748_p7 }
  0x61   :  { %4758 = shalt.err (!%p4755_p11)
}
  0x62   :  { %42 = dma.hbm_to_vmem [thread:$0]  %s6004_s21, 384, %s37_s22, [#allocation6], %s4908_s25, %s4908_s25, %s4909_s1  }
  0x63   :  { %s4912_s18 = smov [#allocation10]   ;;  %s4913_s26 = smov [#allocation13]  }
  0x64   :  { %s63_s8 = sshll.u32 %s4912_s18, 4  ;;  %s84_s19 = sshll.u32 %s4913_s26, 4  ;;  %s64_s8 = int_to_ptr.vmem [resolvable:$true] %s63_s8  ;;  %s85_s19 = int_to_ptr.vmem [resolvable:$true] %s84_s19 }
  0x65   :  { %s4759_s2 = scalar_lea.hbm %s5986_s5, 16 }
  0x66   :  { %p4760_p12 = scmp.ne.s32.totalorder %s5986_s5, %s4759_s2  ;;  %p4763_p13 = scmp.lt.u32.totalorder %s4759_s2, %s5986_s5 }
  0x68   :  { %p4765_p0 = pnand %p4763_p13, %p4760_p12 }
  0x6a   :  { %4768 = shalt.err (!%p4765_p0)
}
  0x6b   :  { %s4769_s22 = scalar_lea.vmem %s64_s8, 16  ;;  %s4773_s21 = scalar_lea.vmem %s64_s8, 32 }
  0x6c   :  { %p4770_p1 = scmp.ne.s32.totalorder %s64_s8, %s4769_s22  ;;  %p4774_p2 = scmp.lt.s32.totalorder %s64_s8, %s64_s8 }
  0x6d   :  { %p4775_p3 = scmp.lt.s32.totalorder %s4773_s21, %s4769_s22 }
  0x6f   :  { %p4776_p4 = por %p4775_p3, %p4774_p2 }
  0x71   :  { %p4777_p5 = pnand %p4776_p4, %p4770_p1 }
  0x73   :  { %4780 = shalt.err (!%p4777_p5)
}
  0x74   :  { %66 = dma.hbm_to_vmem [thread:$0]  %s5986_s5, 16, %s64_s8, [#allocation9]  }
  0x75   :  { %s4781_s18 = scalar_lea.hbm %s5988_s7, 512 }
  0x76   :  { %p4782_p6 = scmp.ne.s32.totalorder %s5988_s7, %s4781_s18  ;;  %p4785_p7 = scmp.lt.u32.totalorder %s4781_s18, %s5988_s7 }
  0x78   :  { %p4787_p8 = pnand %p4785_p7, %p4782_p6 }
  0x7a   :  { %4790 = shalt.err (!%p4787_p8)
}
  0x7b   :  { %s4791_s24 = scalar_lea.vmem %s85_s19, 512  ;;  %p4796_p10 = scmp.lt.s32.totalorder %s85_s19, %s85_s19 }
  0x7c   :  { %p4792_p9 = scmp.ne.s32.totalorder %s85_s19, %s4791_s24  ;;  %p4797_p11 = scmp.lt.s32.totalorder %s4791_s24, %s4791_s24 }
  0x7e   :  { %p4798_p12 = por %p4797_p11, %p4796_p10 }
  0x80   :  { %p4799_p13 = pnand %p4798_p12, %p4792_p9 }
  0x82   :  { %4802 = shalt.err (!%p4799_p13)
}
  0x83   :  { %90 = dma.hbm_to_vmem [thread:$0]  %s5988_s7, 512, %s85_s19, [#allocation12], %s4908_s25, %s4908_s25, %s4909_s1  }
  0x84   :  { %s4914_s27 = smov [#allocation16]   ;;  %s4915_s29 = smov [#allocation19]  }
  0x85   :  { %s106_s28 = sshll.u32 %s4914_s27, 4  ;;  %s128_s22 = sshll.u32 %s4915_s29, 4  ;;  %s107_s28 = int_to_ptr.vmem [resolvable:$true] %s106_s28  ;;  %s129_s22 = int_to_ptr.vmem [resolvable:$true] %s128_s22 }
  0x86   :  { %s4803_s30 = scalar_lea.hbm %s5990_s9, 128 }
  0x87   :  { %p4804_p0 = scmp.ne.s32.totalorder %s5990_s9, %s4803_s30  ;;  %p4807_p1 = scmp.lt.u32.totalorder %s4803_s30, %s5990_s9 }
  0x89   :  { %p4809_p2 = pnand %p4807_p1, %p4804_p0 }
  0x8b   :  { %4812 = shalt.err (!%p4809_p2)
}
  0x8c   :  { %s4813_s7 = scalar_lea.vmem %s107_s28, 128  ;;  %p4818_p4 = scmp.lt.s32.totalorder %s107_s28, %s107_s28 }
  0x8d   :  { %p4814_p3 = scmp.ne.s32.totalorder %s107_s28, %s4813_s7  ;;  %p4819_p5 = scmp.lt.s32.totalorder %s4813_s7, %s4813_s7 }
  0x8f   :  { %p4820_p6 = por %p4819_p5, %p4818_p4 }
  0x91   :  { %p4821_p7 = pnand %p4820_p6, %p4814_p3 }
  0x93   :  { %4824 = shalt.err (!%p4821_p7)
}
  0x94   :  { %112 = dma.hbm_to_vmem [thread:$0]  %s5990_s9, 128, %s107_s28, [#allocation15], %s4908_s25, %s4908_s25, %s4909_s1  }
  0x95   :  { %s4825_s24 = scalar_lea.hbm %s5992_s11, 256 }
  0x96   :  { %p4826_p8 = scmp.ne.s32.totalorder %s5992_s11, %s4825_s24  ;;  %p4829_p9 = scmp.lt.u32.totalorder %s4825_s24, %s5992_s11 }
  0x98   :  { %p4831_p10 = pnand %p4829_p9, %p4826_p8 }
  0x9a   :  { %4834 = shalt.err (!%p4831_p10)
}
  0x9b   :  { %s4835_s21 = scalar_lea.vmem %s129_s22, 256  ;;  %p4840_p12 = scmp.lt.s32.totalorder %s129_s22, %s129_s22 }
  0x9c   :  { %p4836_p11 = scmp.ne.s32.totalorder %s129_s22, %s4835_s21  ;;  %p4841_p13 = scmp.lt.s32.totalorder %s4835_s21, %s4835_s21 }
  0x9e   :  { %p4842_p0 = por %p4841_p13, %p4840_p12 }
  0xa0   :  { %p4843_p1 = pnand %p4842_p0, %p4836_p11 }
  0xa2   :  { %4846 = shalt.err (!%p4843_p1)
}
  0xa3   :  { %134 = dma.hbm_to_vmem [thread:$0]  %s5992_s11, 256, %s129_s22, [#allocation18], %s4908_s25, %s4908_s25, %s4909_s1  }
  0xa4   :  { %s4916_s0 = smov [#allocation20]   ;;  %s4847_s18 = scalar_lea.hbm %s5993_s12, 16 }
  0xa5   :  { %s141_s30 = sshll.u32 %s4916_s0, 4  ;;  %p4848_p2 = scmp.ne.s32.totalorder %s5993_s12, %s4847_s18  ;;  %s142_s30 = int_to_ptr.vmem [resolvable:$true] %s141_s30 }
  0xa6   :  { %p4851_p3 = scmp.lt.u32.totalorder %s4847_s18, %s5993_s12 }
  0xa8   :  { %p4853_p4 = pnand %p4851_p3, %p4848_p2 }
  0xaa   :  { %4856 = shalt.err (!%p4853_p4)
}
  0xab   :  { %s4857_s23 = scalar_lea.vmem %s142_s30, 16  ;;  %s4861_s11 = scalar_lea.vmem %s142_s30, 32 }
  0xac   :  { %p4858_p5 = scmp.ne.s32.totalorder %s142_s30, %s4857_s23  ;;  %p4862_p6 = scmp.lt.s32.totalorder %s142_s30, %s142_s30 }
  0xad   :  { %p4863_p7 = scmp.lt.s32.totalorder %s4861_s11, %s4857_s23 }
  0xaf   :  { %p4864_p8 = por %p4863_p7, %p4862_p6 }
  0xb1   :  { %p4865_p9 = pnand %p4864_p8, %p4858_p5 }
  0xb3   :  { %4868 = shalt.err (!%p4865_p9)
}
  0xb4   :  { %144 = dma.hbm_to_vmem [thread:$0]  %s5993_s12, 16, %s142_s30, [#allocation21]  }
  0xb5   :  { %4891 = dma.done.wait [#allocation6], 384  }
  0xb6   :  { %4892 = vsyncadd [#allocation6], 4294966912 }
  0xb7   :  { %4893 = dma.done.wait [#allocation9], 32  }
  0xb8   :  { %4894 = vsyncadd [#allocation9], 4294967264 }
  0xb9   :  { %4895 = dma.done.wait [#allocation12], 704  }
  0xba   :  { %4896 = vsyncadd [#allocation12], 4294966592 }
  0xbb   :  { %4897 = dma.done.wait [#allocation15], 144  }
  0xbc   :  { %4898 = vsyncadd [#allocation15], 4294967152 }
  0xbd   :  { %4899 = dma.done.wait [#allocation18], 272  }
  0xbe   :  { %4900 = vsyncadd [#allocation18], 4294967024 }
  0xbf   :  { %4901 = dma.done.wait [#allocation21], 16  }
  0xc0   :  { %4902 = vsyncadd [#allocation21], 4294967280  ;;  %vm404_vm0 = vcmask 1046528   ;;  %vm405_vm1 = vcmask 1047552   ;;  %v4917_v0 = vmov 65535   ;;  %v4568_v3 = vld [vmem:[#allocation5 + $0x8] sm:$0xff]  }
  0xc1   :  { %v406_v1 = vsel %vm404_vm0, 4294967295, %v4917_v0  ;;  %s6005_s2 = sld [smem:[#allocation30_spill]]  ;;  %vm310_vm2 = vsmask.f32 7424  ;;  %vm379_vm3 = vcmask 121856   ;;  %v4572_v13 = vld [vmem:[#allocation5] sm:$0xff]  }
  0xc2   :  { %v5147_v2 = vsel %vm405_vm1, %v406_v1, 0  ;;  %v4578_v39 = vld [vmem:[#allocation5 + $0x10] sm:$0xff]   ;;  %vm868_vm4 = vcmask 1031168   ;;  %vm1004_vm5 = vcmask 244736   ;;  %vm1325_vm6 = vcmask 474112   ;;  %s4920_s26 = smov [#allocation22]  }
  0xc3   :  { %v409_v4 = vand.u32 %v4568_v3, %v5147_v2  ;;  %v530_v19 = vand.u32 %v4572_v13, %v5147_v2  ;;  %v678_v43 = vand.u32 %v4578_v39, %v5147_v2  ;;  %vm1431_vm7 = vcmask 1045504   ;;  %s3635_s7 = sshll.u32 %s4920_s26, 4  ;;  %s3636_s7 = int_to_ptr.vmem [resolvable:$true] %s3635_s7 }
  0xc4   :  { %vm1332_vm8 = vcmask 1044480   ;;  %vm1424_vm9 = vcmask 490496   ;;  %vm1486_vm10 = vcmask 982016   ;;  %vm1490_vm12 = vcmask 977920   ;;  %s4869_s19 = scalar_lea.vmem %s3636_s7, 32  ;;  %p4874_p11 = scmp.lt.s32.totalorder %s3636_s7, %s3636_s7 }
  0xc5   :  { %4066 = vmatprep.subr.bf16.mxu0 %v409_v4  ;;  %p4870_p10 = scmp.ne.s32.totalorder %s3636_s7, %s4869_s19  ;;  %p4875_p12 = scmp.lt.s32.totalorder %s4869_s19, %s4869_s19 }
  0xc6   :  { %4067 = vmatpush3.bf16.msra.mxu0 %v409_v4 }
  0xc7   :  { %v5153_v5 = vld [vmem:[%s6005_s2] sm:$0xff]   ;;  %v5158_v6 = vld [vmem:[%s6005_s2 + $0x8] sm:$0xff]   ;;  %v5163_v7 = vld [vmem:[%s6005_s2 + $0x10] sm:$0xff]   ;;  %4084 = vmatprep.subr.bf16.mxu0 %v530_v19  ;;  %p4876_p13 = por %p4875_p12, %p4874_p11 }
  0xc8   :  { %v312_v8 = vshrl.u32 %v5153_v5, 16  ;;  %v314_v9 = vshll.u32 %v5153_v5, 16  ;;  %v319_v10 = vshll.u32 %v5158_v6, 16  ;;  %v323_v11 = vshrl.u32 %v5158_v6, 16  ;;  %v5173_v16 = vld [vmem:[%s6005_s2 + $0x18] sm:$0xff]   ;;  %v5180_v20 = vld [vmem:[%s6005_s2 + $0x20] sm:$0xff]  }
  0xc9   :  { %v327_v12 = vshll.u32 %v5163_v7, 16  ;;  %v331_v17 = vshrl.u32 %v5163_v7, 16  ;;  %v335_v23 = vshll.u32 %v5173_v16, 16  ;;  %v339_v24 = vshrl.u32 %v5173_v16, 16  ;;  %v5188_v27 = vld [vmem:[%s6005_s2 + $0x28] sm:$0xff]   ;;  %v5194_v29 = vld [vmem:[%s6005_s2 + $0x30] sm:$0xff]   ;;  %p4877_p0 = pnand %p4876_p13, %p4870_p10 }
  0xca   :  { %v316_v14 = vrot.slane %v314_v9, 1  ;;  %v321_v15 = vrot.slane %v319_v10, 1  ;;  %v343_v26 = vshll.u32 %v5180_v20, 16  ;;  %v347_v28 = vshrl.u32 %v5180_v20, 16  ;;  %v5201_v33 = vld [vmem:[%s6005_s2 + $0x38] sm:$0xff]   ;;  %v4579_v9 = vld [vmem:[%s5984_s3] sm:$0xff]  }
  0xcb   :  { %v329_v18 = vrot.slane %v327_v12, 1  ;;  %v337_v32 = vrot.slane %v335_v23, 1  ;;  %v351_v34 = vshll.u32 %v5188_v27, 16  ;;  %v359_v38 = vshll.u32 %v5194_v29, 16  ;;  %4136 = vmatprep.mubr.msk.bf16.mxu1 %vm868_vm4, %v4579_v9  ;;  %v3684_v10 = vld [vmem:[#allocation8] ss:$0 sm:$0xff] }
  0xcc   :  { %v317_v21 = vor.u32 %v316_v14, %v312_v8  ;;  %v325_v22 = vor.u32 %v323_v11, %v321_v15  ;;  %v345_v36 = vrot.slane %v343_v26, 1  ;;  %v367_v42 = vshll.u32 %v5201_v33, 16  ;;  %v4583_v9 = vld [vmem:[%s5985_s4 + $0x10] sm:$0xff]  }
  0xcd   :  { %v333_v25 = vor.u32 %v331_v17, %v329_v18  ;;  %v341_v37 = vor.u32 %v339_v24, %v337_v32  ;;  %v353_v41 = vrot.slane %v351_v34, 1  ;;  %v355_v44 = vshrl.u32 %v5188_v27, 16 }
  0xce   :  { %v322_v30 = vsel %vm310_vm2, %v317_v21, %v321_v15  ;;  %v330_v31 = vsel %vm310_vm2, %v325_v22, %v329_v18  ;;  %v349_v40 = vor.u32 %v347_v28, %v345_v36  ;;  %v361_v46 = vrot.slane %v359_v38, 1 }
  0xcf   :  { %4068 = vmatprep.mubr.msk.bf16.mxu0 %vm379_vm3, %v322_v30  ;;  %v338_v35 = vsel %vm310_vm2, %v333_v25, %v337_v32  ;;  %v346_v45 = vsel %vm310_vm2, %v341_v37, %v345_v36  ;;  %v363_v47 = vshrl.u32 %v5194_v29, 16  ;;  %v369_v49 = vrot.slane %v367_v42, 1 }
  0xd0   :  { %4069 = vmatmul.mubr.msk.bf16.vlgmr.msra.gmra.mrb[0].mxu0 %vm379_vm3, %v330_v31  ;;  %v354_v48 = vsel %vm310_vm2, %v349_v40, %v353_v41  ;;  %v371_v50 = vshrl.u32 %v5201_v33, 16  ;;  %v357_v51 = vor.u32 %v355_v44, %v353_v41  ;;  %v633_v56 = vrot.slane %v5153_v5, 1 }
  0xd1   :  { %4085 = vmatpush3.bf16.msra.mxu0 %v530_v19  ;;  %4072 = vmatprep.mubr.msk.bf16.mxu0 %vm379_vm3, %v338_v35  ;;  %v365_v52 = vor.u32 %v363_v47, %v361_v46  ;;  %v634_v57 = vrot.slane %v5158_v6, 1  ;;  %v636_v59 = vrot.slane %v5163_v7, 1  ;;  %v638_v60 = vrot.slane %v5173_v16, 1 }
  0xd2   :  { %4102 = vmatprep.subr.bf16.mxu0 %v678_v43  ;;  %v362_v53 = vsel %vm310_vm2, %v357_v51, %v361_v46  ;;  %v373_v55 = vor.u32 %v371_v50, %v369_v49  ;;  %v640_v63 = vrot.slane %v5180_v20, 1  ;;  %v642_v0 = vrot.slane %v5188_v27, 1 }
  0xd3   :  { %v370_v54 = vsel %vm310_vm2, %v365_v52, %v369_v49  ;;  %v635_v58 = vsel %vm404_vm0, %v633_v56, %v634_v57  ;;  %v637_v61 = vsel %vm404_vm0, %v634_v57, %v636_v59  ;;  %v639_v62 = vsel %vm404_vm0, %v636_v59, %v638_v60 }
  0xd4   :  { %v641_v1 = vsel %vm404_vm0, %v638_v60, %v640_v63  ;;  %v643_v3 = vsel %vm404_vm0, %v640_v63, %v642_v0  ;;  %v644_v4 = vrot.slane %v5194_v29, 1 }
  0xd8   :  { %4073 = vmatmul.mubr.msk.bf16.gmra.mrb[4].mxu0 %vm379_vm3, %v346_v45 }
  0xd9   :  { %4076 = vmatprep.mubr.msk.bf16.mxu0 %vm379_vm3, %v354_v48 }
  0xe0   :  { %4077 = vmatmul.mubr.msk.bf16.gmra.mrb[8].mxu0 %vm379_vm3, %v362_v53 }
  0xe1   :  { %4080 = vmatprep.mubr.msk.bf16.mxu0 %vm379_vm3, %v370_v54 }
  0xe8   :  { %4081 = vmatmul.mubr.msk.bf16.gmra.mrb[12].mxu0 %vm379_vm3, %v373_v55 }
  0xe9   :  { %4086 = vmatprep.mubr.msk.bf16.mxu0 %vm379_vm3, %v5153_v5 }
  0xf0   :  { %4087 = vmatmul.mubr.msk.bf16.vlgmr.msra.gmra.mrb[0].mxu0 %vm379_vm3, %v5158_v6  ;;  %v646_v6 = vrot.slane %v5201_v33, 1 }
  0xf1   :  { %4103 = vmatpush3.bf16.msra.mxu0 %v678_v43  ;;  %4090 = vmatprep.mubr.msk.bf16.mxu0 %vm379_vm3, %v5163_v7  ;;  %v645_v7 = vsel %vm404_vm0, %v642_v0, %v644_v4 }
  0xf2   :  { %v647_v8 = vsel %vm404_vm0, %v644_v4, %v646_v6 }
  0xf8   :  { %4091 = vmatmul.mubr.msk.bf16.gmra.mrb[4].mxu0 %vm379_vm3, %v5173_v16 }
  0xf9   :  { %4094 = vmatprep.mubr.msk.bf16.mxu0 %vm379_vm3, %v5180_v20 }
 0x100   :  { %4095 = vmatmul.mubr.msk.bf16.gmra.mrb[8].mxu0 %vm379_vm3, %v5188_v27 }
 0x101   :  { %4098 = vmatprep.mubr.msk.bf16.mxu0 %vm379_vm3, %v5194_v29 }
 0x108   :  { %4099 = vmatmul.mubr.msk.bf16.gmra.mrb[12].mxu0 %vm379_vm3, %v5201_v33 }
 0x109   :  { %4104 = vmatprep.mubr.msk.bf16.mxu0 %vm379_vm3, %v635_v58 }
 0x110   :  { %4105 = vmatmul.mubr.msk.bf16.vlgmr.msra.gmra.mrb[0].mxu0 %vm379_vm3, %v637_v61 }
 0x111   :  { %4108 = vmatprep.mubr.msk.bf16.mxu0 %vm379_vm3, %v639_v62 }
 0x118   :  { %4109 = vmatmul.mubr.msk.bf16.gmra.mrb[4].mxu0 %vm379_vm3, %v641_v1 }
 0x119   :  { %4112 = vmatprep.mubr.msk.bf16.mxu0 %vm379_vm3, %v643_v3 }
 0x120   :  { %4113 = vmatmul.mubr.msk.bf16.gmra.mrb[8].mxu0 %vm379_vm3, %v645_v7  ;;  %v4581_v7 = vld [vmem:[%s5984_s3 + $0x10] sm:$0xff]  }
 0x121   :  { %4116 = vmatprep.mubr.msk.bf16.mxu0 %vm379_vm3, %v647_v8  ;;  %v4582_v8 = vld [vmem:[%s5984_s3 + $0x18] sm:$0x3f]  }
 0x128   :  { %4117 = vmatmul.mubr.msk.bf16.gmra.mrb[12].mxu0 %vm379_vm3, %v646_v6  ;;  %v4580_v6 = vld [vmem:[%s5984_s3 + $0x8] sm:$0xff]  }
 0x1e3   :  { %v4106_v11 = vpop.f32.mrb[0].mxu0 }
 0x1e4   :  { %v802_v12 = vadd.f32 %v4106_v11, %v3684_v10  ;;  %v714_v13 = vpop.f32.mrb[1].mxu0 }
 0x1e5   :  { %v800_v14 = vadd.f32 %v3684_v10, %v714_v13  ;;  %v4107_v15 = vpop.f32.mrb[2].mxu0 }
 0x1e6   :  { %v803_v16 = vadd.f32 %v4107_v15, %v3684_v10  ;;  %v717_v17 = vpop.f32.mrb[3].mxu0  ;;  %v818_v19 = vmax.f32 %v802_v12, 0.0  ;;  %v4585_v12 = vld [vmem:[%s5985_s4] sm:$0xff]  }
 0x1e7   :  { %v801_v18 = vadd.f32 %v3684_v10, %v717_v17  ;;  %v816_v21 = vmax.f32 %v800_v14, 0.0 }
 0x1e8   :  { %v819_v20 = vmax.f32 %v803_v16, 0.0 }
 0x1e9   :  { %v817_v22 = vmax.f32 %v801_v18, 0.0 }
 0x1ea   :  { %v841_v23 = vpack.c.bf16 %v819_v20, %v818_v19 }
 0x1eb   :  { %v4110_v24 = vpop.f32.mrb[4].mxu0  ;;  %v840_v25 = vpack.c.bf16 %v817_v22, %v816_v21 }
 0x1ec   :  { %v806_v26 = vadd.f32 %v4110_v24, %v3684_v10  ;;  %v730_v27 = vpop.f32.mrb[5].mxu0 }
 0x1ed   :  { %v804_v28 = vadd.f32 %v3684_v10, %v730_v27  ;;  %v4111_v29 = vpop.f32.mrb[6].mxu0  ;;  %4120 = vmatprep.subr.bf16.mxu1 %v840_v25 }
 0x1ee   :  { %v807_v30 = vadd.f32 %v4111_v29, %v3684_v10  ;;  %v733_v31 = vpop.f32.mrb[7].mxu0  ;;  %4121 = vmatpush3.bf16.msra.mxu1 %v840_v25  ;;  %v822_v33 = vmax.f32 %v806_v26, 0.0 }
 0x1ef   :  { %v805_v32 = vadd.f32 %v3684_v10, %v733_v31  ;;  %4122 = vmatprep.subr.bf16.mxu1 %v841_v23  ;;  %v820_v35 = vmax.f32 %v804_v28, 0.0 }
 0x1f0   :  { %v823_v34 = vmax.f32 %v807_v30, 0.0 }
 0x1f1   :  { %v821_v36 = vmax.f32 %v805_v32, 0.0 }
 0x1f2   :  { %v843_v37 = vpack.c.bf16 %v823_v34, %v822_v33  ;;  %4123 = vmatpush3.bf16.msra.mxu1 %v841_v23 }
 0x1f3   :  { %v842_v38 = vpack.c.bf16 %v821_v36, %v820_v35  ;;  %v4114_v39 = vpop.f32.mrb[8].mxu0 }
 0x1f4   :  { %v810_v40 = vadd.f32 %v4114_v39, %v3684_v10  ;;  %v746_v41 = vpop.f32.mrb[9].mxu0 }
 0x1f5   :  { %v808_v42 = vadd.f32 %v3684_v10, %v746_v41  ;;  %v4115_v43 = vpop.f32.mrb[10].mxu0  ;;  %4124 = vmatprep.subr.bf16.mxu1 %v842_v38 }
 0x1f6   :  { %v811_v44 = vadd.f32 %v4115_v43, %v3684_v10  ;;  %v749_v45 = vpop.f32.mrb[11].mxu0  ;;  %4125 = vmatpush3.bf16.msra.mxu1 %v842_v38  ;;  %v826_v47 = vmax.f32 %v810_v40, 0.0  ;;  %v4586_v38 = vld [vmem:[%s5985_s4 + $0x8] sm:$0x7f]  }
 0x1f7   :  { %v809_v46 = vadd.f32 %v3684_v10, %v749_v45  ;;  %4126 = vmatprep.subr.bf16.mxu1 %v843_v37  ;;  %v824_v49 = vmax.f32 %v808_v42, 0.0  ;;  %v1105_v43 = vsel %vm404_vm0, %v4586_v38, 0 }
 0x1f8   :  { %v827_v48 = vmax.f32 %v811_v44, 0.0  ;;  %v4587_v44 = vld [vmem:[%s5985_s4 + $0x20] sm:$0xff]  }
 0x1f9   :  { %v825_v50 = vmax.f32 %v809_v46, 0.0 }
 0x1fa   :  { %v845_v51 = vpack.c.bf16 %v827_v48, %v826_v47  ;;  %4127 = vmatpush3.bf16.msra.mxu1 %v843_v37  ;;  %v4588_v47 = vld [vmem:[%s5985_s4 + $0x28] sm:$0x7f]  }
 0x1fb   :  { %v844_v52 = vpack.c.bf16 %v825_v50, %v824_v49  ;;  %v4118_v53 = vpop.f32.mrb[12].mxu0  ;;  %v1212_v48 = vsel %vm404_vm0, %v4588_v47, 0 }
 0x1fc   :  { %v814_v54 = vadd.f32 %v4118_v53, %v3684_v10  ;;  %v762_v55 = vpop.f32.mrb[13].mxu0 }
 0x1fd   :  { %v812_v56 = vadd.f32 %v3684_v10, %v762_v55  ;;  %v4119_v57 = vpop.f32.mrb[14].mxu0  ;;  %4128 = vmatprep.subr.bf16.mxu1 %v844_v52 }
 0x1fe   :  { %v815_v58 = vadd.f32 %v4119_v57, %v3684_v10  ;;  %v765_v59 = vpop.f32.mrb[15].mxu0  ;;  %4129 = vmatpush3.bf16.msra.mxu1 %v844_v52  ;;  %v830_v61 = vmax.f32 %v814_v54, 0.0  ;;  %v4591_v57 = vld [vmem:[#allocation13] sm:$0xff]  }
 0x1ff   :  { %v813_v60 = vadd.f32 %v3684_v10, %v765_v59  ;;  %4130 = vmatprep.subr.bf16.mxu1 %v845_v51  ;;  %v828_v63 = vmax.f32 %v812_v56, 0.0  ;;  %v4584_v10 = vld [vmem:[%s5985_s4 + $0x18] sm:$0x7f]   ;;  %4192 = vmatprep.subr.bf16.mxu0 %v4591_v57  ;;  %v4593_v59 = vld [vmem:[#allocation13 + $0x10] sm:$0xff]  }
 0x200   :  { %v831_v62 = vmax.f32 %v815_v58, 0.0  ;;  %v1018_v11 = vsel %vm404_vm0, %v4584_v10, 0  ;;  %v4589_v56 = vld [vmem:[#allocation11] sm:$0xff]   ;;  %v4592_v58 = vld [vmem:[#allocation13 + $0x8] sm:$0xff]   ;;  %4193 = vmatpush3.bf16.msra.mxu0 %v4591_v57 }
 0x201   :  { %v829_v0 = vmax.f32 %v813_v60, 0.0  ;;  %4194 = vmatprep.subr.bf16.mxu0 %v4592_v58  ;;  %v4594_v60 = vld [vmem:[#allocation13 + $0x18] sm:$0x3f]  }
 0x202   :  { %v847_v1 = vpack.c.bf16 %v831_v62, %v830_v61  ;;  %4131 = vmatpush3.bf16.msra.mxu1 %v845_v51  ;;  %v3719_v61 = vld [vmem:[#allocation10] ss:$0 sm:$0xff] }
 0x203   :  { %v846_v3 = vpack.c.bf16 %v829_v0, %v828_v63 }
 0x204   :  { %v882_v4 = vsel %vm404_vm0, %v847_v1, 0  ;;  %4195 = vmatpush3.bf16.msra.mxu0 %v4592_v58 }
 0x205   :  { %4132 = vmatprep.subr.bf16.mxu1 %v846_v3  ;;  %4196 = vmatprep.subr.bf16.mxu0 %v4593_v59 }
 0x206   :  { %4133 = vmatpush3.bf16.msra.mxu1 %v846_v3 }
 0x207   :  { %4538 = vmatprep.subr.msk.bf16.mxu1 %vm404_vm0, %v847_v1 }
 0x208   :  { %4197 = vmatpush3.bf16.msra.mxu0 %v4593_v59 }
 0x209   :  { %4543 = vmatprep.subr.msk.bf16.mxu0 %vm1431_vm7, %v4594_v60 }
 0x20a   :  { %4135 = vmatpush3.bf16.msra.mxu1 %v882_v4 }
 0x20b   :  { %4144 = vmatprep.subr.bf16.mxu1 %v4583_v9 }
 0x20d   :  { %4137 = vmatmul.mubr.msk.bf16.vlgmr.msra.gmra.mrb[0].mxu1 %vm868_vm4, %v4580_v6 }
 0x20e   :  { %4140 = vmatprep.mubr.msk.bf16.mxu1 %vm868_vm4, %v4581_v7  ;;  %4145 = vmatpush3.bf16.msra.mxu1 %v4583_v9 }
 0x20f   :  { %4539 = vmatprep.subr.msk.bf16.mxu1 %vm404_vm0, %v4584_v10 }
 0x212   :  { %4147 = vmatpush3.bf16.msra.mxu1 %v1018_v11 }
 0x213   :  { %4156 = vmatprep.subr.bf16.mxu1 %v4585_v12 }
 0x215   :  { %4141 = vmatmul.mubr.msk.bf16.gmra.mrb[4].mxu1 %vm868_vm4, %v4582_v8 }
 0x2e0   :  { %v4138_v13 = vpop.f32.mrb[0].mxu1 }
 0x2e1   :  { %v918_v14 = vpop.f32.mrb[1].mxu1 }
 0x2e2   :  { %v4139_v15 = vpop.f32.mrb[2].mxu1 }
 0x2e3   :  { %v5291_v16 = vpack.c.bf16 %v4139_v15, %v4138_v13  ;;  %v921_v17 = vpop.f32.mrb[3].mxu1 }
 0x2e4   :  { %v5293_v18 = vpack.c.bf16 %v921_v17, %v918_v14 }
 0x2e5   :  { %v970_v20 = vshll.u32 %v5291_v16, 16  ;;  %v974_v33 = vshrl.u32 %v5291_v16, 16  ;;  %v1182_v50 = vrot.slane %v5291_v16, 1 }
 0x2e6   :  { %v965_v19 = vshll.u32 %v5293_v18, 16  ;;  %v963_v22 = vshrl.u32 %v5293_v18, 16  ;;  %v1181_v49 = vrot.slane %v5293_v18, 1 }
 0x2e7   :  { %v972_v27 = vrot.slane %v970_v20, 1 }
 0x2e8   :  { %v4142_v21 = vpop.f32.mrb[4].mxu1  ;;  %v967_v23 = vrot.slane %v965_v19, 1  ;;  %v1183_v51 = vsel %vm404_vm0, %v1181_v49, %v1182_v50 }
 0x2e9   :  { %v934_v24 = vpop.f32.mrb[5].mxu1  ;;  %v976_v35 = vor.u32 %v974_v33, %v972_v27  ;;  %v4590_v33 = vld [vmem:[#allocation11 + $0x8] ss:$0 sps:$4 sm:$0x33]  }
 0x2ea   :  { %v4143_v25 = vpop.f32.mrb[6].mxu1  ;;  %v968_v26 = vor.u32 %v967_v23, %v963_v22 }
 0x2eb   :  { %v5298_v28 = vpack.c.bf16 %v4143_v25, %v4142_v21  ;;  %v937_v29 = vpop.f32.mrb[7].mxu1 }
 0x2ec   :  { %v5300_v30 = vpack.c.bf16 %v937_v29, %v934_v24  ;;  %v973_v31 = vsel %vm310_vm2, %v968_v26, %v972_v27 }
 0x2ed   :  { %4148 = vmatprep.mubr.msk.bf16.mxu1 %vm1004_vm5, %v973_v31  ;;  %v986_v34 = vshll.u32 %v5298_v28, 16  ;;  %v990_v45 = vshrl.u32 %v5298_v28, 16  ;;  %v1186_v53 = vrot.slane %v5298_v28, 1 }
 0x2ee   :  { %v978_v32 = vshll.u32 %v5300_v30, 16  ;;  %v982_v37 = vshrl.u32 %v5300_v30, 16  ;;  %v1184_v52 = vrot.slane %v5300_v30, 1 }
 0x2ef   :  { %v988_v41 = vrot.slane %v986_v34, 1  ;;  %v1433_v34 = vsel %vm1431_vm7, %v4594_v60, 0  ;;  %v5399_v60 = vld [vmem:[%s6005_s2 + $0x60] sm:$0xff]  }
 0x2f0   :  { %v980_v36 = vrot.slane %v978_v32, 1  ;;  %v1185_v54 = vsel %vm404_vm0, %v1182_v50, %v1184_v52  ;;  %v1187_v55 = vsel %vm404_vm0, %v1184_v52, %v1186_v53  ;;  %4199 = vmatpush3.bf16.msra.mxu0 %v1433_v34  ;;  %v5380_v52 = vld [vmem:[%s6005_s2 + $0x50] sm:$0xff]  }
 0x2f1   :  { %v992_v46 = vor.u32 %v990_v45, %v988_v41  ;;  %v1901_v58 = vshrl.u32 %v5380_v52, 16 }
 0x2f2   :  { %v981_v39 = vsel %vm310_vm2, %v976_v35, %v980_v36  ;;  %v984_v40 = vor.u32 %v982_v37, %v980_v36  ;;  %v4595_v35 = vld [vmem:[#allocation19] sm:$0xff]  }
 0x2f3   :  { %4149 = vmatmul.mubr.msk.bf16.vlgmr.msra.gmra.mrb[8].mxu1 %vm1004_vm5, %v981_v39  ;;  %4222 = vmatprep.subr.bf16.mxu0 %v4595_v35 }
 0x2f4   :  { %4157 = vmatpush3.bf16.msra.mxu1 %v4585_v12  ;;  %v989_v42 = vsel %vm310_vm2, %v984_v40, %v988_v41 }
 0x2f5   :  { %4152 = vmatprep.mubr.msk.bf16.mxu1 %vm1004_vm5, %v989_v42  ;;  %4540 = vmatprep.subr.msk.bf16.mxu1 %vm404_vm0, %v4586_v38  ;;  %v4596_v42 = vld [vmem:[#allocation19 + $0x8] sm:$0x7f]  }
 0x2f8   :  { %4159 = vmatpush3.bf16.msra.mxu1 %v1105_v43  ;;  %v4597_v43 = vld [vmem:[#allocation5 + $0x8] sm:$0xff]  }
 0x2f9   :  { %4168 = vmatprep.subr.bf16.mxu1 %v4587_v44  ;;  %v1974_v45 = vand.u32 %v4597_v43, %v5147_v2 }
 0x2fb   :  { %4153 = vmatmul.mubr.msk.bf16.gmra.mrb[12].mxu1 %vm1004_vm5, %v992_v46  ;;  %v5369_v46 = vld [vmem:[%s6005_s2 + $0x48] sm:$0xff]  }
 0x2fc   :  { %4160 = vmatprep.mubr.msk.bf16.mxu1 %vm1004_vm5, %v5293_v18 }
 0x303   :  { %4161 = vmatmul.mubr.msk.bf16.vlgmr.msra.gmra.mrb[8].mxu1 %vm1004_vm5, %v5291_v16 }
 0x304   :  { %4164 = vmatprep.mubr.msk.bf16.mxu1 %vm1004_vm5, %v5300_v30  ;;  %4169 = vmatpush3.bf16.msra.mxu1 %v4587_v44  ;;  %v5357_v44 = vld [vmem:[%s6005_s2 + $0x40] sm:$0xff]  }
 0x305   :  { %4541 = vmatprep.subr.msk.bf16.mxu1 %vm404_vm0, %v4588_v47  ;;  %v1884_v47 = vshll.u32 %v5357_v44, 16  ;;  %v1882_v49 = vshrl.u32 %v5357_v44, 16  ;;  %v2196_v34 = vrot.slane %v5357_v44, 1 }
 0x307   :  { %v1886_v50 = vrot.slane %v1884_v47, 1 }
 0x308   :  { %4171 = vmatpush3.bf16.msra.mxu1 %v1212_v48  ;;  %v4601_v48 = vld [vmem:[#allocation5] sm:$0xff]  }
 0x30b   :  { %4165 = vmatmul.mubr.msk.bf16.gmra.mrb[12].mxu1 %vm1004_vm5, %v5298_v28 }
 0x30c   :  { %4172 = vmatprep.mubr.msk.bf16.mxu1 %vm1004_vm5, %v1183_v51  ;;  %v2095_v51 = vand.u32 %v4601_v48, %v5147_v2 }
 0x313   :  { %4173 = vmatmul.mubr.msk.bf16.vlgmr.msra.gmra.mrb[8].mxu1 %vm1004_vm5, %v1185_v54 }
 0x314   :  { %4176 = vmatprep.mubr.msk.bf16.mxu1 %vm1004_vm5, %v1187_v55  ;;  %v5387_v55 = vld [vmem:[%s6005_s2 + $0x58] sm:$0xff]  }
 0x315   :  { %v1905_v59 = vshll.u32 %v5387_v55, 16 }
 0x31b   :  { %4177 = vmatmul.mubr.msk.bf16.gmra.mrb[12].mxu1 %vm1004_vm5, %v1186_v53  ;;  %v1887_v53 = vor.u32 %v1886_v50, %v1882_v49  ;;  %v4608_v50 = vld [vmem:[#allocation16] sm:$0xff]  }
 0x31c   :  { %4188 = vmatprep.mubr.msk.bf16.mxu1 %vm1325_vm6, %v4589_v56  ;;  %v1897_v56 = vshll.u32 %v5380_v52, 16 }
 0x3e6   :  { %v4174_v62 = vpop.f32.mrb[8].mxu1 }
 0x3e7   :  { %v1296_v63 = vadd.f32 %v4174_v62, %v3719_v61  ;;  %v1248_v0 = vpop.f32.mrb[9].mxu1 }
 0x3e8   :  { %v1294_v1 = vadd.f32 %v3719_v61, %v1248_v0  ;;  %v4175_v3 = vpop.f32.mrb[10].mxu1  ;;  %v5405_v0 = vld [vmem:[%s6005_s2 + $0x68] sm:$0xff]  }
 0x3e9   :  { %v1297_v4 = vadd.f32 %v4175_v3, %v3719_v61  ;;  %v1251_v6 = vpop.f32.mrb[11].mxu1  ;;  %v1304_v8 = vmax.f32 %v1296_v63, 0.0  ;;  %v1907_v63 = vrot.slane %v1905_v59, 1  ;;  %v1913_v3 = vshll.u32 %v5399_v60, 16  ;;  %v3724_v59 = vld [vmem:[#allocation14] ss:$0 sm:$0xff] }
 0x3ea   :  { %v1295_v7 = vadd.f32 %v3719_v61, %v1251_v6  ;;  %v1302_v10 = vmax.f32 %v1294_v1, 0.0  ;;  %v4607_v1 = vld [vmem:[#allocation5 + $0x10] sm:$0xff]  }
 0x3eb   :  { %v1305_v9 = vmax.f32 %v1297_v4, 0.0  ;;  %v1909_v4 = vshrl.u32 %v5387_v55, 16 }
 0x3ec   :  { %v1303_v11 = vmax.f32 %v1295_v7, 0.0  ;;  %v1917_v7 = vshrl.u32 %v5399_v60, 16 }
 0x3ed   :  { %v1314_v12 = vpack.c.bf16 %v1305_v9, %v1304_v8  ;;  %v1921_v8 = vshll.u32 %v5405_v0, 16  ;;  %v2241_v9 = vand.u32 %v4607_v1, %v5147_v2 }
 0x3ee   :  { %v1313_v13 = vpack.c.bf16 %v1303_v11, %v1302_v10  ;;  %v4178_v14 = vpop.f32.mrb[12].mxu1  ;;  %v1915_v10 = vrot.slane %v1913_v3, 1  ;;  %v5418_v11 = vld [vmem:[%s6005_s2 + $0x70] sm:$0xff]  }
 0x3ef   :  { %v1300_v15 = vadd.f32 %v4178_v14, %v3719_v61  ;;  %v1264_v17 = vpop.f32.mrb[13].mxu1  ;;  %v1923_v14 = vrot.slane %v1921_v8, 1 }
 0x3f0   :  { %v1298_v19 = vadd.f32 %v3719_v61, %v1264_v17  ;;  %v4179_v20 = vpop.f32.mrb[14].mxu1  ;;  %4180 = vmatprep.subr.bf16.mxu1 %v1313_v13  ;;  %v1929_v17 = vshll.u32 %v5418_v11, 16 }
 0x3f1   :  { %v1301_v21 = vadd.f32 %v4179_v20, %v3719_v61  ;;  %v1267_v22 = vpop.f32.mrb[15].mxu1  ;;  %4181 = vmatpush3.bf16.msra.mxu1 %v1313_v13  ;;  %v1308_v24 = vmax.f32 %v1300_v15, 0.0  ;;  %v1919_v13 = vor.u32 %v1917_v7, %v1915_v10  ;;  %v5424_v15 = vld [vmem:[%s6005_s2 + $0x78] sm:$0xff]   ;;  %v1925_v20 = vshrl.u32 %v5405_v0, 16 }
 0x3f2   :  { %v1299_v23 = vadd.f32 %v3719_v61, %v1267_v22  ;;  %4182 = vmatprep.subr.bf16.mxu1 %v1314_v12  ;;  %v1306_v26 = vmax.f32 %v1298_v19, 0.0  ;;  %v1933_v22 = vshrl.u32 %v5418_v11, 16  ;;  %v2209_v47 = vrot.slane %v5424_v15, 1 }
 0x3f3   :  { %v1309_v25 = vmax.f32 %v1301_v21, 0.0  ;;  %v1924_v21 = vsel %vm310_vm2, %v1919_v13, %v1923_v14 }
 0x3f4   :  { %v1307_v27 = vmax.f32 %v1299_v23, 0.0  ;;  %v1937_v23 = vshll.u32 %v5424_v15, 16 }
 0x3f5   :  { %v1316_v29 = vpack.c.bf16 %v1309_v25, %v1308_v24  ;;  %4183 = vmatpush3.bf16.msra.mxu1 %v1314_v12  ;;  %v1911_v12 = vor.u32 %v1909_v4, %v1907_v63  ;;  %v1931_v24 = vrot.slane %v1929_v17, 1  ;;  %v1927_v25 = vor.u32 %v1925_v20, %v1923_v14 }
 0x3f6   :  { %v1315_v31 = vpack.c.bf16 %v1307_v27, %v1306_v26  ;;  %v1939_v27 = vrot.slane %v1937_v23, 1 }
 0x3f7   :  { %v1334_v32 = vsel %vm1332_vm8, %v1316_v29, 0  ;;  %v1916_v19 = vsel %vm310_vm2, %v1911_v12, %v1915_v10  ;;  %v1935_v26 = vor.u32 %v1933_v22, %v1931_v24  ;;  %v3741_v12 = vld [vmem:[#allocation20] ss:$0 sm:$0xff] }
 0x3f8   :  { %4184 = vmatprep.subr.bf16.mxu1 %v1315_v31 }
 0x3f9   :  { %4185 = vmatpush3.bf16.msra.mxu1 %v1315_v31  ;;  %v1940_v31 = vsel %vm310_vm2, %v1935_v26, %v1939_v27 }
 0x3fa   :  { %4542 = vmatprep.subr.msk.bf16.mxu1 %vm1332_vm8, %v1316_v29  ;;  %v1932_v29 = vsel %vm310_vm2, %v1927_v25, %v1931_v24 }
 0x3fd   :  { %4187 = vmatpush3.bf16.msra.mxu1 %v1334_v32  ;;  %v1941_v32 = vshrl.u32 %v5424_v15, 16 }
 0x400   :  { %4189 = vmatmul.mubr.msk.bf16.vlgmr.msra.gmra.mrb[16].mxu1 %vm1325_vm6, %v4590_v33  ;;  %v1943_v33 = vor.u32 %v1941_v32, %v1939_v27 }
 0x401   :  { %4206 = vmatprep.mubr.msk.bf16.mxu1 %vm379_vm3, %v5153_v5  ;;  %v1712_v5 = vsel %vm404_vm0, %v4596_v42, 0 }
 0x4d3   :  { %v4190_v36 = vpop.f32.mrb[16].mxu1 }
 0x4d4   :  { %v1370_v37 = vpop.f32.mrb[17].mxu1  ;;  %v1385_v41 = vpack.c.bf16 %v4190_v36, %v4190_v36 }
 0x4d5   :  { %v4191_v38 = vpop.f32.mrb[18].mxu1 }
 0x4d6   :  { %v1373_v39 = vpop.f32.mrb[19].mxu1  ;;  %v2201_v38 = vrot.slane %v5387_v55, 1 }
 0x4d7   :  { %v1384_v40 = vpack.c.bf16 %v1373_v39, %v1370_v37  ;;  %v2199_v37 = vrot.slane %v5380_v52, 1 }
 0x4d9   :  { %4200 = vmatprep.mubr.msk.bf16.mxu0 %vm1424_vm9, %v1384_v40  ;;  %v2202_v40 = vsel %vm404_vm0, %v2199_v37, %v2201_v38 }
 0x4da   :  { %4201 = vmatmul.mubr.msk.bf16.vlgmr.msra.gmra.mrb[16].mxu0 %vm1424_vm9, %v1385_v41  ;;  %v2203_v41 = vrot.slane %v5399_v60, 1 }
 0x4db   :  { %4223 = vmatpush3.bf16.msra.mxu0 %v4595_v35  ;;  %4226 = vmatprep.mubr.msk.bf16.mxu0 %vm1004_vm5, %v5293_v18  ;;  %v1889_v18 = vshll.u32 %v5369_v46, 16  ;;  %v2197_v35 = vrot.slane %v5369_v46, 1 }
 0x4dc   :  { %4544 = vmatprep.subr.msk.bf16.mxu0 %vm404_vm0, %v4596_v42  ;;  %v2205_v42 = vrot.slane %v5405_v0, 1  ;;  %v2204_v43 = vsel %vm404_vm0, %v2201_v38, %v2203_v41 }
 0x4dd   :  { %v1891_v54 = vrot.slane %v1889_v18, 1  ;;  %v2198_v36 = vsel %vm404_vm0, %v2196_v34, %v2197_v35  ;;  %v2200_v39 = vsel %vm404_vm0, %v2197_v35, %v2199_v37  ;;  %v4609_v18 = vld [vmem:[#allocation16] sm:$0xff]  }
 0x4df   :  { %4225 = vmatpush3.bf16.msra.mxu0 %v1712_v5  ;;  %v1892_v57 = vsel %vm310_vm2, %v1887_v53, %v1891_v54  ;;  %v2206_v5 = vsel %vm404_vm0, %v2203_v41, %v2205_v42  ;;  %v3069_v53 = vand.u32 %v4609_v18, %v5147_v2 }
 0x4e0   :  { %4234 = vmatprep.subr.bf16.mxu0 %v1974_v45 }
 0x4e2   :  { %4227 = vmatmul.mubr.msk.bf16.vlgmr.msra.gmra.mrb[20].mxu0 %vm1004_vm5, %v5291_v16  ;;  %v1893_v16 = vshrl.u32 %v5369_v46, 16 }
 0x4e3   :  { %4230 = vmatprep.mubr.msk.bf16.mxu0 %vm1004_vm5, %v5300_v30  ;;  %4235 = vmatpush3.bf16.msra.mxu0 %v1974_v45  ;;  %v1899_v30 = vrot.slane %v1897_v56, 1  ;;  %v2207_v45 = vrot.slane %v5418_v11, 1  ;;  %v4642_v56 = vld [vmem:[%s6005_s2 + $0x8] sm:$0xff]  }
 0x4e4   :  { %4252 = vmatprep.subr.bf16.mxu0 %v2095_v51  ;;  %v1895_v61 = vor.u32 %v1893_v16, %v1891_v54  ;;  %v4918_v54 = vmov 0.0   ;;  %v4648_v16 = vld [vmem:[%s6005_s2 + $0x38] sm:$0xff]  }
 0x4e5   :  { %v1903_v62 = vor.u32 %v1901_v58, %v1899_v30  ;;  %v2208_v48 = vsel %vm404_vm0, %v2205_v42, %v2207_v45  ;;  %v2210_v49 = vsel %vm404_vm0, %v2207_v45, %v2209_v47 }
 0x4e7   :  { %v1908_v6 = vsel %vm310_vm2, %v1903_v62, %v1907_v63 }
 0x4ea   :  { %4231 = vmatmul.mubr.msk.bf16.gmra.mrb[24].mxu0 %vm1004_vm5, %v5298_v28  ;;  %v1900_v28 = vsel %vm310_vm2, %v1895_v61, %v1899_v30  ;;  %v4610_v30 = vld [vmem:[%s5984_s3] sm:$0xff]  }
 0x4eb   :  { %4236 = vmatprep.mubr.msk.bf16.mxu0 %vm379_vm3, %v1892_v57  ;;  %v184_v57 = vlaneseq }
 0x4ed   :  { %v5526_v58 = vshrl.u32 %v184_v57, 7 }
 0x4ef   :  { %v187_v61 = vadd.s32 16, %v5526_v58  ;;  %v201_v63 = vand.u32 1, %v5526_v58  ;;  %v189_v14 = vadd.s32 32, %v5526_v58  ;;  %v191_v22 = vadd.s32 48, %v5526_v58 }
 0x4f0   :  { %v190_v27 = vadd.s32 40, %v5526_v58  ;;  %v192_v38 = vadd.s32 56, %v5526_v58 }
 0x4f1   :  { %vm217_vm11 = vcmp.eq.s32.totalorder %v201_v63, 0  ;;  %v207_v42 = vand.u32 1, %v191_v22 }
 0x4f2   :  { %4237 = vmatmul.mubr.msk.bf16.vlgmr.msra.gmra.mrb[28].mxu0 %vm379_vm3, %v1900_v28  ;;  %v186_v28 = vadd.s32 8, %v5526_v58  ;;  %v5545_v25 = vsel %vm217_vm11, 1.0, %v4918_v54 }
 0x4f3   :  { %4253 = vmatpush3.bf16.msra.mxu0 %v2095_v51  ;;  %4240 = vmatprep.mubr.msk.bf16.mxu0 %vm379_vm3, %v1908_v6  ;;  %v1518_v51 = vand.u32 %v4608_v50, %v5147_v2  ;;  %v4643_v2 = vld [vmem:[%s6005_s2 + $0x10] sm:$0xff]   ;;  %v188_v6 = vadd.s32 24, %v5526_v58 }
 0x4f4   :  { %4270 = vmatprep.subr.bf16.mxu0 %v2241_v9  ;;  %v202_v13 = vand.u32 1, %v186_v28 }
 0x4f5   :  { %4204 = vmatprep.subr.bf16.mxu1 %v1518_v51 }
 0x4f6   :  { %4205 = vmatpush3.bf16.msra.mxu1 %v1518_v51  ;;  %vm218_vm14 = vcmp.eq.s32.totalorder %v202_v13, 0 }
 0x4f7   :  { %v5560_v45 = vsel %vm218_vm14, 1.0, %v4918_v54  ;;  %vm1501_vm14 = vcmask 974848  }
 0x4f9   :  { %4207 = vmatmul.mubr.msk.bf16.vlgmr.msra.gmra.mrb[20].mxu1 %vm379_vm3, %v4642_v56 }
 0x4fa   :  { %4241 = vmatmul.mubr.msk.bf16.gmra.mrb[32].mxu0 %vm379_vm3, %v1916_v19  ;;  %4210 = vmatprep.mubr.msk.bf16.mxu1 %vm379_vm3, %v4643_v2 }
 0x4fb   :  { %4244 = vmatprep.mubr.msk.bf16.mxu0 %vm379_vm3, %v1924_v21 }
 0x502   :  { %4245 = vmatmul.mubr.msk.bf16.gmra.mrb[36].mxu0 %vm379_vm3, %v1932_v29 }
 0x503   :  { %4248 = vmatprep.mubr.msk.bf16.mxu0 %vm379_vm3, %v1940_v31 }
 0x50a   :  { %4249 = vmatmul.mubr.msk.bf16.gmra.mrb[40].mxu0 %vm379_vm3, %v1943_v33  ;;  %v205_v33 = vand.u32 1, %v189_v14 }
 0x50b   :  { %4254 = vmatprep.mubr.msk.bf16.mxu0 %vm379_vm3, %v5357_v44 }
 0x50c   :  { %vm221_vm1 = vcmp.eq.s32.totalorder %v205_v33, 0 }
 0x512   :  { %4255 = vmatmul.mubr.msk.bf16.vlgmr.msra.gmra.mrb[28].mxu0 %vm379_vm3, %v5369_v46 }
 0x513   :  { %4271 = vmatpush3.bf16.msra.mxu0 %v2241_v9  ;;  %4258 = vmatprep.mubr.msk.bf16.mxu0 %vm379_vm3, %v5380_v52  ;;  %v203_v9 = vand.u32 1, %v187_v61 }
 0x514   :  { %4372 = vmatprep.subr.bf16.mxu0 %v3069_v53 }
 0x515   :  { %vm5539_vm13 = vcmp.eq.s32.totalorder %v203_v9, 0 }
 0x51a   :  { %4259 = vmatmul.mubr.msk.bf16.gmra.mrb[32].mxu0 %vm379_vm3, %v5387_v55 }
 0x51b   :  { %4262 = vmatprep.mubr.msk.bf16.mxu0 %vm379_vm3, %v5399_v60 }
 0x522   :  { %4263 = vmatmul.mubr.msk.bf16.gmra.mrb[36].mxu0 %vm379_vm3, %v5405_v0 }
 0x523   :  { %4266 = vmatprep.mubr.msk.bf16.mxu0 %vm379_vm3, %v5418_v11 }
 0x52a   :  { %4267 = vmatmul.mubr.msk.bf16.gmra.mrb[40].mxu0 %vm379_vm3, %v5424_v15 }
 0x52b   :  { %4272 = vmatprep.mubr.msk.bf16.mxu0 %vm379_vm3, %v2198_v36 }
 0x532   :  { %4273 = vmatmul.mubr.msk.bf16.vlgmr.msra.gmra.mrb[28].mxu0 %vm379_vm3, %v2200_v39 }
 0x533   :  { %4276 = vmatprep.mubr.msk.bf16.mxu0 %vm379_vm3, %v2202_v40  ;;  %4373 = vmatpush3.bf16.msra.mxu0 %v3069_v53  ;;  %v208_v53 = vand.u32 1, %v192_v38 }
 0x534   :  { %4410 = vmatprep.subr.bf16.mxu0 %v4918_v54 }
 0x53a   :  { %4277 = vmatmul.mubr.msk.bf16.gmra.mrb[32].mxu0 %vm379_vm3, %v2204_v43 }
 0x53b   :  { %4280 = vmatprep.mubr.msk.bf16.mxu0 %vm379_vm3, %v2206_v5  ;;  %v5557_v5 = vsel %vm5539_vm13, 1.0, %v4918_v54  ;;  %vm5584_vm13 = vcmp.eq.s32.totalorder %v208_v53, 0 }
 0x53c   :  { %v5604_v22 = vsel %vm5584_vm13, 1.0, %v4918_v54 }
 0x542   :  { %4281 = vmatmul.mubr.msk.bf16.gmra.mrb[36].mxu0 %vm379_vm3, %v2208_v48 }
 0x543   :  { %4284 = vmatprep.mubr.msk.bf16.mxu0 %vm379_vm3, %v2210_v49 }
 0x54a   :  { %4285 = vmatmul.mubr.msk.bf16.gmra.mrb[40].mxu0 %vm379_vm3, %v2209_v47  ;;  %v206_v47 = vand.u32 1, %v190_v27 }
 0x54b   :  { %4374 = vmatprep.mubr.msk.bf16.mxu0 %vm379_vm3, %v5357_v44  ;;  %v4644_v44 = vld [vmem:[%s6005_s2 + $0x18] sm:$0xff]  }
 0x54c   :  { %4211 = vmatmul.mubr.msk.bf16.gmra.mrb[24].mxu1 %vm379_vm3, %v4644_v44  ;;  %vm5577_vm11 = vcmp.eq.s32.totalorder %v206_v47, 0 }
 0x54d   :  { %v5597_v14 = vsel %vm5577_vm11, 1.0, %v4918_v54 }
 0x552   :  { %4375 = vmatmul.mubr.msk.bf16.vlgmr.msra.gmra.mrb[44].mxu0 %vm379_vm3, %v5369_v46  ;;  %v4645_v46 = vld [vmem:[%s6005_s2 + $0x20] sm:$0xff]  }
 0x553   :  { %4378 = vmatprep.mubr.msk.bf16.mxu0 %vm379_vm3, %v5380_v52  ;;  %4214 = vmatprep.mubr.msk.bf16.mxu1 %vm379_vm3, %v4645_v46  ;;  %v4646_v52 = vld [vmem:[%s6005_s2 + $0x28] sm:$0xff]  }
 0x554   :  { %4215 = vmatmul.mubr.msk.bf16.gmra.mrb[28].mxu1 %vm379_vm3, %v4646_v52 }
 0x55a   :  { %4379 = vmatmul.mubr.msk.bf16.gmra.mrb[48].mxu0 %vm379_vm3, %v5387_v55  ;;  %v4647_v55 = vld [vmem:[%s6005_s2 + $0x30] sm:$0xff]  }
 0x55b   :  { %4382 = vmatprep.mubr.msk.bf16.mxu0 %vm379_vm3, %v5399_v60  ;;  %4218 = vmatprep.mubr.msk.bf16.mxu1 %vm379_vm3, %v4647_v55 }
 0x55c   :  { %4219 = vmatmul.mubr.msk.bf16.gmra.mrb[32].mxu1 %vm379_vm3, %v4648_v16  ;;  %v5575_v16 = vsel %vm221_vm1, 1.0, %v4918_v54  ;;  %vm6001_vm1 = vcmask 483328  }
 0x55d   :  { %4304 = vmatprep.mubr.msk.bf16.mxu1 %vm868_vm4, %v4610_v30 }
 0x562   :  { %4383 = vmatmul.mubr.msk.bf16.gmra.mrb[52].mxu0 %vm379_vm3, %v5405_v0 }
 0x563   :  { %4386 = vmatprep.mubr.msk.bf16.mxu0 %vm379_vm3, %v5418_v11 }
 0x56a   :  { %4387 = vmatmul.mubr.msk.bf16.gmra.mrb[56].mxu0 %vm379_vm3, %v5424_v15  ;;  %v204_v15 = vand.u32 1, %v188_v6  ;;  %vm5570_vm3 = vcmp.eq.s32.totalorder %v207_v42, 0 }
 0x56b   :  { %v5592_v13 = vsel %vm5570_vm3, 1.0, %v4918_v54 }
 0x56c   :  { %vm5549_vm15 = vcmp.eq.s32.totalorder %v204_v15, 0 }
 0x56d   :  { %v5566_v51 = vsel %vm5549_vm15, 1.0, %v4918_v54  ;;  %vm1808_vm15 = vcmask 486400  }
 0x5ad   :  { %v4202_v60 = vpop.f32.mrb[16].mxu0 }
 0x5ae   :  { %v1469_v62 = vpop.f32.mrb[17].mxu0  ;;  %v1478_v0 = vadd.f32 %v4202_v60, %v3724_v59 }
 0x5af   :  { %v1470_v1 = vadd.f32 %v3724_v59, %v1469_v62  ;;  %v4203_v3 = vpop.f32.mrb[18].mxu0 }
 0x5b0   :  { %v1472_v4 = vpop.f32.mrb[19].mxu0  ;;  %v1485_v10 = vmax.f32 %v1478_v0, 0.0 }
 0x5b1   :  { %v1483_v7 = vmax.f32 %v1470_v1, 0.0  ;;  %v1473_v8 = vadd.f32 %v3724_v59, %v1472_v4 }
 0x5b2   :  { %v1491_v29 = vsel %vm1490_vm12, %v1485_v10, 0.0 }
 0x5b3   :  { %v1484_v11 = vmax.f32 %v1473_v8, 0.0  ;;  %v1487_v17 = vsel %vm1486_vm10, %v1483_v7, 0.0 }
 0x5b5   :  { %v1488_v19 = vsel %vm1486_vm10, %v1484_v11, 0.0  ;;  %v4228_v21 = vpop.f32.mrb[20].mxu0 }
 0x5b6   :  { %v1489_v23 = vadd.f32 %v1488_v19, %v1487_v17  ;;  %v1757_v24 = vadd.f32 %v4228_v21, %v3741_v12  ;;  %v1748_v26 = vpop.f32.mrb[21].mxu0 }
 0x5b7   :  { %v1749_v31 = vadd.f32 %v3741_v12, %v1748_v26  ;;  %v4229_v32 = vpop.f32.mrb[22].mxu0 }
 0x5b8   :  { %v1492_v34 = vadd.f32 %v1491_v29, %v1489_v23  ;;  %v1760_v36 = vadd.f32 %v4229_v32, %v3741_v12  ;;  %v1751_v37 = vpop.f32.mrb[23].mxu0  ;;  %v1781_v39 = vmax.f32 %v1757_v24, 0.0 }
 0x5b9   :  { %v1779_v40 = vmax.f32 %v1749_v31, 0.0  ;;  %v1752_v41 = vadd.f32 %v3741_v12, %v1751_v37 }
 0x5ba   :  { %v1493_v43 = vrot.slane %v1492_v34, 4  ;;  %v1782_v49 = vmax.f32 %v1760_v36, 0.0  ;;  %v1789_v56 = vmul.f32 %v1781_v39, %v5557_v5 }
 0x5bb   :  { %v1787_v48 = vmul.f32 %v1779_v40, %v5545_v25  ;;  %v1780_v50 = vmax.f32 %v1752_v41, 0.0 }
 0x5bc   :  { %v1494_v18 = vadd.f32 %v1493_v43, %v1492_v34  ;;  %v1790_v60 = vmul.f32 %v1782_v49, %v5566_v51  ;;  %v1798_v6 = vsel %vm1424_vm9, %v1789_v56, 0.0 }
 0x5bd   :  { %v1788_v2 = vmul.f32 %v1780_v50, %v5560_v45  ;;  %v4232_v46 = vpop.f32.mrb[24].mxu0  ;;  %v1795_v30 = vsel %vm1424_vm9, %v1787_v48, 0.0  ;;  %v3799_v48 = vld [vmem:[#allocation8] ss:$0 sm:$0xff] }
 0x5be   :  { %v1495_v52 = vrot.slane %v1494_v18, 2  ;;  %v1773_v55 = vadd.f32 %v4232_v46, %v3741_v12  ;;  %v1764_v57 = vpop.f32.mrb[25].mxu0  ;;  %v1800_v15 = vsel %vm1424_vm9, %v1790_v60, 0.0 }
 0x5bf   :  { %v1796_v61 = vsel %vm1424_vm9, %v1788_v2, 0.0  ;;  %v1765_v62 = vadd.f32 %v3741_v12, %v1764_v57  ;;  %v4233_v63 = vpop.f32.mrb[26].mxu0 }
 0x5c0   :  { %v1496_v0 = vadd.f32 %v1495_v52, %v1494_v18  ;;  %v1797_v1 = vadd.f32 %v1796_v61, %v1795_v30  ;;  %v1776_v28 = vadd.f32 %v4233_v63, %v3741_v12  ;;  %v1767_v4 = vpop.f32.mrb[27].mxu0  ;;  %v1785_v7 = vmax.f32 %v1773_v55, 0.0 }
 0x5c1   :  { %v1783_v8 = vmax.f32 %v1765_v62, 0.0  ;;  %v1768_v9 = vadd.f32 %v3741_v12, %v1767_v4 }
 0x5c2   :  { %v1497_v10 = vrot.slane %v1496_v0, 1  ;;  %v1799_v11 = vadd.f32 %v1798_v6, %v1797_v1  ;;  %v1786_v19 = vmax.f32 %v1776_v28, 0.0  ;;  %v1793_v23 = vmul.f32 %v1785_v7, %v5592_v13 }
 0x5c3   :  { %v1791_v17 = vmul.f32 %v1783_v8, %v5575_v16  ;;  %v1784_v20 = vmax.f32 %v1768_v9, 0.0 }
 0x5c4   :  { %v1498_v21 = vadd.f32 %v1497_v10, %v1496_v0  ;;  %v1801_v12 = vadd.f32 %v1800_v15, %v1799_v11  ;;  %v1794_v31 = vmul.f32 %v1786_v19, %v5604_v22  ;;  %v1806_v34 = vsel %vm1424_vm9, %v1793_v23, 0.0 }
 0x5c5   :  { %v1802_v24 = vsel %vm1424_vm9, %v1791_v17, 0.0  ;;  %v1792_v26 = vmul.f32 %v1784_v20, %v5597_v14 }
 0x5c6   :  { %v1500_v27 = vmul.f32 0.05, %v1498_v21  ;;  %v1803_v29 = vadd.f32 %v1802_v24, %v1801_v12  ;;  %v1809_v36 = vsel %vm1808_vm15, %v1794_v31, 0.0 }
 0x5c7   :  { %v1804_v32 = vsel %vm1424_vm9, %v1792_v26, 0.0 }
 0x5c8   :  { %1502 = vst.msk [vmem:[#allocation2] sm:$0x1] %vm1501_vm14, %v1500_v27  ;;  %v1805_v33 = vadd.f32 %v1804_v32, %v1803_v29 }
 0x5ca   :  { %v1807_v35 = vadd.f32 %v1806_v34, %v1805_v33 }
 0x5cc   :  { %v1810_v37 = vadd.f32 %v1809_v36, %v1807_v35 }
 0x5ce   :  { %v1811_v38 = vrot.slane %v1810_v37, 4 }
 0x5d0   :  { %v1812_v39 = vadd.f32 %v1811_v38, %v1810_v37 }
 0x5d2   :  { %v1813_v40 = vrot.slane %v1812_v39, 2 }
 0x5d4   :  { %v1814_v41 = vadd.f32 %v1813_v40, %v1812_v39 }
 0x5d6   :  { %v1815_v42 = vrot.slane %v1814_v41, 1 }
 0x5d8   :  { %v1816_v43 = vadd.f32 %v1815_v42, %v1814_v41 }
 0x5da   :  { %v1817_v47 = vmul.f32 0.033333335, %v1816_v43 }
 0x5dc   :  { %1819 = vst.msk [vmem:[#allocation4] sm:$0x1] %vm6001_vm1, %v1817_v47 }
 0x605   :  { %v4274_v49 = vpop.f32.mrb[28].mxu0 }
 0x606   :  { %v2365_v50 = vadd.f32 %v4274_v49, %v3799_v48  ;;  %v2277_v18 = vpop.f32.mrb[29].mxu0 }
 0x607   :  { %v2363_v53 = vadd.f32 %v3799_v48, %v2277_v18  ;;  %v4275_v56 = vpop.f32.mrb[30].mxu0 }
 0x608   :  { %v2366_v2 = vadd.f32 %v4275_v56, %v3799_v48  ;;  %v2280_v44 = vpop.f32.mrb[31].mxu0  ;;  %v2381_v52 = vmax.f32 %v2365_v50, 0.0  ;;  %v4611_v56 = vld [vmem:[%s5984_s3 + $0x8] sm:$0xff]  }
 0x609   :  { %v2364_v46 = vadd.f32 %v3799_v48, %v2280_v44  ;;  %v2379_v57 = vmax.f32 %v2363_v53, 0.0  ;;  %v193_v44 = vadd.s32 64, %v5526_v58 }
 0x60a   :  { %v2382_v55 = vmax.f32 %v2366_v2, 0.0  ;;  %v195_v2 = vadd.s32 80, %v5526_v58 }
 0x60b   :  { %v2380_v59 = vmax.f32 %v2364_v46, 0.0  ;;  %v196_v46 = vadd.s32 88, %v5526_v58 }
 0x60c   :  { %v2404_v30 = vpack.c.bf16 %v2382_v55, %v2381_v52  ;;  %v194_v52 = vadd.s32 72, %v5526_v58  ;;  %v211_v55 = vand.u32 1, %v195_v2 }
 0x60d   :  { %v2403_v60 = vpack.c.bf16 %v2380_v59, %v2379_v57  ;;  %v4278_v61 = vpop.f32.mrb[32].mxu0  ;;  %v209_v57 = vand.u32 1, %v193_v44  ;;  %v212_v59 = vand.u32 1, %v196_v46 }
 0x60e   :  { %v2369_v62 = vadd.f32 %v4278_v61, %v3799_v48  ;;  %v2293_v63 = vpop.f32.mrb[33].mxu0  ;;  %v197_v61 = vadd.s32 96, %v5526_v58  ;;  %vm227_vm3 = vcmp.eq.s32.totalorder %v211_v55, 0 }
 0x60f   :  { %v2367_v0 = vadd.f32 %v3799_v48, %v2293_v63  ;;  %v4279_v1 = vpop.f32.mrb[34].mxu0  ;;  %4288 = vmatprep.subr.bf16.mxu1 %v2403_v60  ;;  %v200_v63 = vadd.s32 120, %v5526_v58  ;;  %vm225_vm11 = vcmp.eq.s32.totalorder %v209_v57, 0  ;;  %vm5636_vm13 = vcmp.eq.s32.totalorder %v212_v59, 0 }
 0x610   :  { %v2370_v3 = vadd.f32 %v4279_v1, %v3799_v48  ;;  %v2296_v28 = vpop.f32.mrb[35].mxu0  ;;  %4289 = vmatpush3.bf16.msra.mxu1 %v2403_v60  ;;  %v2385_v6 = vmax.f32 %v2369_v62, 0.0  ;;  %v199_v60 = vadd.s32 112, %v5526_v58  ;;  %v4613_v62 = vld [vmem:[%s5984_s3 + $0x18] sm:$0x3f]  }
 0x611   :  { %v2368_v4 = vadd.f32 %v3799_v48, %v2296_v28  ;;  %4290 = vmatprep.subr.bf16.mxu1 %v2404_v30  ;;  %v2383_v8 = vmax.f32 %v2367_v0, 0.0  ;;  %v198_v0 = vadd.s32 104, %v5526_v58  ;;  %v5648_v58 = vsel %vm227_vm3, 1.0, %v4918_v54 }
 0x612   :  { %v2386_v7 = vmax.f32 %v2370_v3, 0.0  ;;  %v215_v28 = vand.u32 1, %v199_v60 }
 0x613   :  { %v2384_v9 = vmax.f32 %v2368_v4, 0.0  ;;  %v213_v4 = vand.u32 1, %v197_v61 }
 0x614   :  { %v2406_v10 = vpack.c.bf16 %v2386_v7, %v2385_v6  ;;  %4291 = vmatpush3.bf16.msra.mxu1 %v2404_v30  ;;  %v210_v30 = vand.u32 1, %v194_v52  ;;  %v5644_v6 = vld [vmem:[#allocation17] ss:$0 sm:$0xff]  ;;  %v4208_v7 = vpop.f32.mrb[20].mxu1 }
 0x615   :  { %v2405_v11 = vpack.c.bf16 %v2384_v9, %v2383_v8  ;;  %v4282_v15 = vpop.f32.mrb[36].mxu0  ;;  %v5651_v9 = vsel %vm225_vm11, 1.0, %v4918_v54  ;;  %vm5671_vm3 = vcmp.eq.s32.totalorder %v213_v4, 0 }
 0x616   :  { %v2373_v17 = vadd.f32 %v4282_v15, %v3799_v48  ;;  %v2309_v19 = vpop.f32.mrb[37].mxu0  ;;  %vm5640_vm1 = vcmp.eq.s32.totalorder %v210_v30, 0  ;;  %v1563_v15 = vadd.f32 %v4208_v7, %v5644_v6 }
 0x617   :  { %v2371_v20 = vadd.f32 %v3799_v48, %v2309_v19  ;;  %v4283_v21 = vpop.f32.mrb[38].mxu0  ;;  %4292 = vmatprep.subr.bf16.mxu1 %v2405_v11  ;;  %v1554_v19 = vpop.f32.mrb[21].mxu1 }
 0x618   :  { %v2374_v12 = vadd.f32 %v4283_v21, %v3799_v48  ;;  %v2312_v23 = vpop.f32.mrb[39].mxu0  ;;  %4293 = vmatpush3.bf16.msra.mxu1 %v2405_v11  ;;  %v2389_v26 = vmax.f32 %v2373_v17, 0.0  ;;  %v214_v11 = vand.u32 1, %v198_v0  ;;  %v5658_v21 = vsel %vm5636_vm13, 1.0, %v4918_v54 }
 0x619   :  { %v2372_v24 = vadd.f32 %v3799_v48, %v2312_v23  ;;  %4294 = vmatprep.subr.bf16.mxu1 %v2406_v10  ;;  %v2387_v29 = vmax.f32 %v2371_v20, 0.0  ;;  %v1555_v23 = vadd.f32 %v5644_v6, %v1554_v19  ;;  %vm1687_vm13 = vcmask 237568  }
 0x61a   :  { %v2390_v27 = vmax.f32 %v2374_v12, 0.0  ;;  %v5663_v12 = vsel %vm5640_vm1, 1.0, %v4918_v54  ;;  %vm5683_vm11 = vcmp.eq.s32.totalorder %v214_v11, 0 }
 0x61b   :  { %v2388_v31 = vmax.f32 %v2372_v24, 0.0 }
 0x61c   :  { %v2408_v32 = vpack.c.bf16 %v2390_v27, %v2389_v26  ;;  %4295 = vmatpush3.bf16.msra.mxu1 %v2406_v10  ;;  %v216_v10 = vand.u32 1, %v200_v63  ;;  %v4209_v26 = vpop.f32.mrb[22].mxu1 }
 0x61d   :  { %v2407_v33 = vpack.c.bf16 %v2388_v31, %v2387_v29  ;;  %v4286_v34 = vpop.f32.mrb[40].mxu0  ;;  %v5729_v29 = vsel %vm5683_vm11, 1.0, %v4918_v54 }
 0x61e   :  { %v2377_v35 = vadd.f32 %v4286_v34, %v3799_v48  ;;  %v2325_v36 = vpop.f32.mrb[41].mxu0  ;;  %v1566_v34 = vadd.f32 %v4209_v26, %v5644_v6  ;;  %vm5679_vm1 = vcmp.eq.s32.totalorder %v216_v10, 0 }
 0x61f   :  { %v2375_v37 = vadd.f32 %v3799_v48, %v2325_v36  ;;  %v4287_v38 = vpop.f32.mrb[42].mxu0  ;;  %4296 = vmatprep.subr.bf16.mxu1 %v2407_v33  ;;  %v1557_v36 = vpop.f32.mrb[23].mxu1 }
 0x620   :  { %v2378_v39 = vadd.f32 %v4287_v38, %v3799_v48  ;;  %v2328_v40 = vpop.f32.mrb[43].mxu0  ;;  %4297 = vmatpush3.bf16.msra.mxu1 %v2407_v33  ;;  %v2393_v42 = vmax.f32 %v2377_v35, 0.0  ;;  %v1617_v38 = vmax.f32 %v1555_v23, 0.0  ;;  %v4212_v61 = vpop.f32.mrb[24].mxu1 }
 0x621   :  { %v2376_v41 = vadd.f32 %v3799_v48, %v2328_v40  ;;  %4298 = vmatprep.subr.bf16.mxu1 %v2408_v32  ;;  %v2391_v47 = vmax.f32 %v2375_v37, 0.0  ;;  %v4612_v48 = vld [vmem:[%s5984_s3 + $0x10] sm:$0xff]   ;;  %v1558_v40 = vadd.f32 %v5644_v6, %v1557_v36  ;;  %v1579_v1 = vadd.f32 %v4212_v61, %v5644_v6 }
 0x622   :  { %v2394_v43 = vmax.f32 %v2378_v39, 0.0 }
 0x623   :  { %v2392_v49 = vmax.f32 %v2376_v41, 0.0  ;;  %v1623_v23 = vmax.f32 %v1579_v1, 0.0 }
 0x624   :  { %v2410_v50 = vpack.c.bf16 %v2394_v43, %v2393_v42  ;;  %4299 = vmatpush3.bf16.msra.mxu1 %v2408_v32  ;;  %v1619_v32 = vmax.f32 %v1563_v15, 0.0 }
 0x625   :  { %v2409_v18 = vpack.c.bf16 %v2392_v49, %v2391_v47  ;;  %v4376_v8 = vpop.f32.mrb[44].mxu0  ;;  %v1639_v31 = vmul.f32 %v1623_v23, %v5592_v13 }
 0x626   :  { %v2444_v53 = vsel %vm404_vm0, %v2410_v50, 0  ;;  %v3114_v17 = vadd.f32 %v4376_v8, %v5644_v6  ;;  %v3105_v20 = vpop.f32.mrb[45].mxu0  ;;  %v1635_v47 = vmul.f32 %v1619_v32, %v5557_v5 }
 0x627   :  { %4300 = vmatprep.subr.bf16.mxu1 %v2409_v18  ;;  %v3106_v24 = vadd.f32 %v5644_v6, %v3105_v20  ;;  %v4377_v27 = vpop.f32.mrb[46].mxu0 }
 0x628   :  { %4301 = vmatpush3.bf16.msra.mxu1 %v2409_v18  ;;  %v3170_v33 = vmax.f32 %v3114_v17, 0.0  ;;  %v3117_v35 = vadd.f32 %v4377_v27, %v5644_v6  ;;  %v3108_v37 = vpop.f32.mrb[47].mxu0  ;;  %v1652_v44 = vsel %vm1004_vm5, %v1635_v47, 0.0 }
 0x629   :  { %4545 = vmatprep.subr.msk.bf16.mxu1 %vm404_vm0, %v2410_v50  ;;  %v3168_v39 = vmax.f32 %v3106_v24, 0.0  ;;  %v3109_v41 = vadd.f32 %v5644_v6, %v3108_v37  ;;  %v1620_v50 = vmax.f32 %v1566_v34, 0.0 }
 0x62a   :  { %v3186_v49 = vmul.f32 %v3170_v33, %v5557_v5  ;;  %v3171_v18 = vmax.f32 %v3117_v35, 0.0 }
 0x62b   :  { %v3169_v2 = vmax.f32 %v3109_v41, 0.0  ;;  %v1636_v52 = vmul.f32 %v1620_v50, %v5566_v51 }
 0x62c   :  { %4303 = vmatpush3.bf16.msra.mxu1 %v2444_v53  ;;  %v1633_v53 = vmul.f32 %v1617_v38, %v5545_v25  ;;  %v3203_v46 = vsel %vm1004_vm5, %v3186_v49, 0.0  ;;  %v3187_v55 = vmul.f32 %v3171_v18, %v5566_v51 }
 0x62d   :  { %v3185_v60 = vmul.f32 %v3169_v2, %v5560_v45  ;;  %v1654_v63 = vsel %vm1004_vm5, %v1636_v52, 0.0 }
 0x62e   :  { %v1649_v57 = vsel %vm1004_vm5, %v1633_v53, 0.0  ;;  %v3205_v0 = vsel %vm1004_vm5, %v3187_v55, 0.0  ;;  %v5724_v53 = vsel %vm5679_vm1, 1.0, %v4918_v54 }
 0x62f   :  { %4305 = vmatmul.mubr.msk.bf16.vlgmr.msra.gmra.mrb[36].mxu1 %vm868_vm4, %v4611_v56  ;;  %v3184_v56 = vmul.f32 %v3168_v39, %v5545_v25  ;;  %v3201_v8 = vsel %vm1004_vm5, %v3185_v60, 0.0  ;;  %v5717_v39 = vsel %vm5671_vm3, 1.0, %v4918_v54 }
 0x630   :  { %4308 = vmatprep.mubr.msk.bf16.mxu1 %vm868_vm4, %v4612_v48  ;;  %v1618_v48 = vmax.f32 %v1558_v40, 0.0 }
 0x631   :  { %v3200_v59 = vsel %vm1004_vm5, %v3184_v56, 0.0 }
 0x632   :  { %v1634_v30 = vmul.f32 %v1618_v48, %v5560_v45  ;;  %v3202_v20 = vadd.f32 %v3201_v8, %v3200_v59 }
 0x634   :  { %v1650_v7 = vsel %vm1004_vm5, %v1634_v30, 0.0  ;;  %v3204_v37 = vadd.f32 %v3203_v46, %v3202_v20 }
 0x635   :  { %v1651_v19 = vadd.f32 %v1650_v7, %v1649_v57 }
 0x636   :  { %v3206_v18 = vadd.f32 %v3205_v0, %v3204_v37 }
 0x637   :  { %4309 = vmatmul.mubr.msk.bf16.gmra.mrb[40].mxu1 %vm868_vm4, %v4613_v62  ;;  %vm5667_vm4 = vcmp.eq.s32.totalorder %v215_v28, 0  ;;  %v4380_v62 = vpop.f32.mrb[48].mxu0  ;;  %v1570_v28 = vpop.f32.mrb[25].mxu1  ;;  %v1653_v36 = vadd.f32 %v1652_v44, %v1651_v19 }
 0x638   :  { %v3130_v3 = vadd.f32 %v4380_v62, %v5644_v6  ;;  %v3121_v4 = vpop.f32.mrb[49].mxu0  ;;  %v1571_v10 = vadd.f32 %v5644_v6, %v1570_v28  ;;  %v4213_v15 = vpop.f32.mrb[26].mxu1  ;;  %v5712_v38 = vsel %vm5667_vm4, 1.0, %v4918_v54 }
 0x639   :  { %v3122_v11 = vadd.f32 %v5644_v6, %v3121_v4  ;;  %v4381_v17 = vpop.f32.mrb[50].mxu0  ;;  %v1573_v26 = vpop.f32.mrb[27].mxu1  ;;  %v1582_v34 = vadd.f32 %v4213_v15, %v5644_v6  ;;  %v1655_v50 = vadd.f32 %v1654_v63, %v1653_v36 }
 0x63a   :  { %v3174_v24 = vmax.f32 %v3130_v3, 0.0  ;;  %v3124_v27 = vpop.f32.mrb[51].mxu0  ;;  %v1621_v32 = vmax.f32 %v1571_v10, 0.0  ;;  %v3133_v35 = vadd.f32 %v4381_v17, %v5644_v6  ;;  %v4216_v44 = vpop.f32.mrb[28].mxu1  ;;  %v1574_v42 = vadd.f32 %v5644_v6, %v1573_v26 }
 0x63b   :  { %v3172_v33 = vmax.f32 %v3122_v11, 0.0  ;;  %v1624_v47 = vmax.f32 %v1582_v34, 0.0  ;;  %v4384_v46 = vpop.f32.mrb[52].mxu0  ;;  %v3125_v57 = vadd.f32 %v5644_v6, %v3124_v27  ;;  %v1586_v59 = vpop.f32.mrb[29].mxu1  ;;  %v1595_v61 = vadd.f32 %v4216_v44, %v5644_v6 }
 0x63c   :  { %v1637_v40 = vmul.f32 %v1621_v32, %v5575_v16  ;;  %v3175_v49 = vmax.f32 %v3133_v35, 0.0  ;;  %v3190_v56 = vmul.f32 %v3174_v24, %v5592_v13  ;;  %v3137_v43 = vpop.f32.mrb[53].mxu0  ;;  %v3146_v62 = vadd.f32 %v4384_v46, %v5644_v6  ;;  %v4217_v63 = vpop.f32.mrb[30].mxu1 }
 0x63d   :  { %v3188_v41 = vmul.f32 %v3172_v33, %v5575_v16  ;;  %v1640_v30 = vmul.f32 %v1624_v47, %v5604_v22  ;;  %v4385_v0 = vpop.f32.mrb[54].mxu0  ;;  %v1622_v1 = vmax.f32 %v1574_v42, 0.0  ;;  %v3173_v3 = vmax.f32 %v3125_v57, 0.0  ;;  %v1589_v7 = vpop.f32.mrb[31].mxu1 }
 0x63e   :  { %v1656_v48 = vsel %vm1004_vm5, %v1637_v40, 0.0  ;;  %v3191_v60 = vmul.f32 %v3175_v49, %v5604_v22  ;;  %v1587_v28 = vadd.f32 %v5644_v6, %v1586_v59  ;;  %v3138_v4 = vadd.f32 %v5644_v6, %v3137_v43  ;;  %v3140_v8 = vpop.f32.mrb[55].mxu0 }
 0x63f   :  { %v3207_v2 = vsel %vm1004_vm5, %v3188_v41, 0.0  ;;  %v1657_v52 = vadd.f32 %v1656_v48, %v1655_v50  ;;  %v1627_v10 = vmax.f32 %v1595_v61, 0.0  ;;  %v3178_v11 = vmax.f32 %v3146_v62, 0.0  ;;  %v4220_v50 = vpop.f32.mrb[32].mxu1 }
 0x640   :  { %v3208_v55 = vadd.f32 %v3207_v2, %v3206_v18  ;;  %v1598_v15 = vadd.f32 %v4217_v63, %v5644_v6  ;;  %v3149_v17 = vadd.f32 %v4385_v0, %v5644_v6  ;;  %v1638_v19 = vmul.f32 %v1622_v1, %v5597_v14  ;;  %v4388_v18 = vpop.f32.mrb[56].mxu0  ;;  %v1602_v2 = vpop.f32.mrb[33].mxu1 }
 0x641   :  { %v3189_v20 = vmul.f32 %v3173_v3, %v5597_v14  ;;  %v1625_v23 = vmax.f32 %v1587_v28, 0.0  ;;  %v3176_v24 = vmax.f32 %v3138_v4, 0.0  ;;  %v1660_v26 = vsel %vm1004_vm5, %v1639_v31, 0.0  ;;  %v3153_v44 = vpop.f32.mrb[57].mxu0  ;;  %v4221_v59 = vpop.f32.mrb[34].mxu1 }
 0x642   :  { %v3211_v27 = vsel %vm1004_vm5, %v3190_v56, 0.0  ;;  %v1643_v32 = vmul.f32 %v1627_v10, %v5648_v58  ;;  %v3194_v33 = vmul.f32 %v3178_v11, %v5648_v58  ;;  %v1658_v34 = vsel %vm1004_vm5, %v1638_v19, 0.0  ;;  %v4389_v43 = vpop.f32.mrb[58].mxu0  ;;  %v1605_v61 = vpop.f32.mrb[35].mxu1 }
 0x643   :  { %v3209_v35 = vsel %vm1004_vm5, %v3189_v20, 0.0  ;;  %v1641_v36 = vmul.f32 %v1625_v23, %v5651_v9  ;;  %v3192_v37 = vmul.f32 %v3176_v24, %v5651_v9  ;;  %v1662_v40 = vsel %vm1004_vm5, %v1640_v30, 0.0  ;;  %v3156_v62 = vpop.f32.mrb[59].mxu0 }
 0x644   :  { %v3213_v41 = vsel %vm1004_vm5, %v3191_v60, 0.0  ;;  %v1659_v47 = vadd.f32 %v1658_v34, %v1657_v52  ;;  %v3210_v49 = vadd.f32 %v3209_v35, %v3208_v55  ;;  %v1668_v31 = vsel %vm1004_vm5, %v1643_v32, 0.0 }
 0x645   :  { %v3219_v58 = vsel %vm1004_vm5, %v3194_v33, 0.0  ;;  %v1628_v56 = vmax.f32 %v1598_v15, 0.0  ;;  %v3179_v48 = vmax.f32 %v3149_v17, 0.0  ;;  %v1590_v9 = vadd.f32 %v5644_v6, %v1589_v7 }
 0x646   :  { %v1661_v46 = vadd.f32 %v1660_v26, %v1659_v47  ;;  %v3212_v42 = vadd.f32 %v3211_v27, %v3210_v49  ;;  %v3141_v57 = vadd.f32 %v5644_v6, %v3140_v8  ;;  %v1664_v52 = vsel %vm1004_vm5, %v1641_v36, 0.0 }
 0x647   :  { %v3215_v55 = vsel %vm1004_vm5, %v3192_v37, 0.0  ;;  %v1611_v30 = vadd.f32 %v4220_v50, %v5644_v6  ;;  %v3162_v60 = vadd.f32 %v4388_v18, %v5644_v6  ;;  %v1626_v1 = vmax.f32 %v1590_v9, 0.0 }
 0x648   :  { %v1663_v63 = vadd.f32 %v1662_v40, %v1661_v46  ;;  %v3214_v0 = vadd.f32 %v3213_v41, %v3212_v42  ;;  %v3177_v3 = vmax.f32 %v3141_v57, 0.0  ;;  %v1644_v28 = vmul.f32 %v1628_v56, %v5658_v21 }
 0x649   :  { %v3195_v4 = vmul.f32 %v3179_v48, %v5658_v21  ;;  %v1603_v7 = vadd.f32 %v5644_v6, %v1602_v2  ;;  %v3154_v8 = vadd.f32 %v5644_v6, %v3153_v44  ;;  %v1642_v15 = vmul.f32 %v1626_v1, %v5663_v12 }
 0x64a   :  { %v1665_v10 = vadd.f32 %v1664_v52, %v1663_v63  ;;  %v3216_v11 = vadd.f32 %v3215_v55, %v3214_v0  ;;  %v3193_v17 = vmul.f32 %v3177_v3, %v5663_v12  ;;  %v1631_v19 = vmax.f32 %v1611_v30, 0.0 }
 0x64b   :  { %v3182_v20 = vmax.f32 %v3162_v60, 0.0  ;;  %v1629_v23 = vmax.f32 %v1603_v7, 0.0  ;;  %v3180_v24 = vmax.f32 %v3154_v8, 0.0  ;;  %v1666_v26 = vsel %vm1004_vm5, %v1642_v15, 0.0 }
 0x64c   :  { %v3217_v27 = vsel %vm1004_vm5, %v3193_v17, 0.0  ;;  %v1614_v21 = vadd.f32 %v4221_v59, %v5644_v6  ;;  %v3165_v32 = vadd.f32 %v4389_v43, %v5644_v6  ;;  %v1670_v33 = vsel %vm1004_vm5, %v1644_v28, 0.0 }
 0x64d   :  { %v3221_v34 = vsel %vm1004_vm5, %v3195_v4, 0.0  ;;  %v1667_v35 = vadd.f32 %v1666_v26, %v1665_v10  ;;  %v3218_v36 = vadd.f32 %v3217_v27, %v3216_v11  ;;  %v1645_v12 = vmul.f32 %v1629_v23, %v5717_v39  ;;  %v4614_v27 = vld [vmem:[%s5985_s4 + $0x10] sm:$0xff]  }
 0x64e   :  { %v3196_v37 = vmul.f32 %v3180_v24, %v5717_v39  ;;  %v1632_v40 = vmax.f32 %v1614_v21, 0.0  ;;  %v3183_v41 = vmax.f32 %v3165_v32, 0.0  ;;  %v1606_v50 = vadd.f32 %v5644_v6, %v1605_v61  ;;  %4312 = vmatprep.subr.bf16.mxu1 %v4614_v27  ;;  %v4615_v21 = vld [vmem:[%s5985_s4 + $0x18] sm:$0x7f]  }
 0x64f   :  { %v1669_v47 = vadd.f32 %v1668_v31, %v1667_v35  ;;  %v3220_v49 = vadd.f32 %v3219_v58, %v3218_v36  ;;  %v3157_v18 = vadd.f32 %v5644_v6, %v3156_v62  ;;  %v1647_v56 = vmul.f32 %v1631_v19, %v5712_v38  ;;  %4313 = vmatpush3.bf16.msra.mxu1 %v4614_v27 }
 0x650   :  { %v3198_v48 = vmul.f32 %v3182_v20, %v5712_v38  ;;  %v1672_v2 = vsel %vm1004_vm5, %v1645_v12, 0.0  ;;  %v3223_v44 = vsel %vm1004_vm5, %v3196_v37, 0.0  ;;  %v1630_v9 = vmax.f32 %v1606_v50, 0.0  ;;  %4546 = vmatprep.subr.msk.bf16.mxu1 %vm404_vm0, %v4615_v21 }
 0x651   :  { %v1671_v46 = vadd.f32 %v1670_v33, %v1669_v47  ;;  %v3222_v42 = vadd.f32 %v3221_v34, %v3220_v49  ;;  %v3181_v39 = vmax.f32 %v3157_v18, 0.0  ;;  %v1648_v57 = vmul.f32 %v1632_v40, %v5724_v53  ;;  %v4616_v33 = vld [vmem:[%s5985_s4] sm:$0xff]  }
 0x652   :  { %v3199_v31 = vmul.f32 %v3183_v41, %v5724_v53  ;;  %v1646_v6 = vmul.f32 %v1630_v9, %v5729_v29  ;;  %v1676_v38 = vsel %vm1004_vm5, %v1647_v56, 0.0  ;;  %v3227_v52 = vsel %vm1004_vm5, %v3198_v48, 0.0 }
 0x653   :  { %v1673_v58 = vadd.f32 %v1672_v2, %v1671_v46  ;;  %v3224_v59 = vadd.f32 %v3223_v44, %v3222_v42  ;;  %v3197_v43 = vmul.f32 %v3181_v39, %v5729_v29  ;;  %v1678_v62 = vsel %vm1004_vm5, %v1648_v57, 0.0 }
 0x654   :  { %v1674_v55 = vsel %vm1004_vm5, %v1646_v6, 0.0  ;;  %v3229_v53 = vsel %vm1004_vm5, %v3199_v31, 0.0  ;;  %v2578_v32 = vsel %vm404_vm0, %v4615_v21, 0 }
 0x655   :  { %v3225_v30 = vsel %vm1004_vm5, %v3197_v43, 0.0  ;;  %v1675_v60 = vadd.f32 %v1674_v55, %v1673_v58  ;;  %4315 = vmatpush3.bf16.msra.mxu1 %v2578_v32 }
 0x656   :  { %v3226_v61 = vadd.f32 %v3225_v30, %v3224_v59  ;;  %4324 = vmatprep.subr.bf16.mxu1 %v4616_v33 }
 0x657   :  { %v1677_v63 = vadd.f32 %v1676_v38, %v1675_v60  ;;  %v4617_v38 = vld [vmem:[%s5985_s4 + $0x8] sm:$0x7f]  }
 0x658   :  { %v3228_v0 = vadd.f32 %v3227_v52, %v3226_v61  ;;  %v2665_v61 = vsel %vm404_vm0, %v4617_v38, 0 }
 0x659   :  { %v1679_v1 = vadd.f32 %v1678_v62, %v1677_v63  ;;  %v4618_v62 = vld [vmem:[%s5985_s4 + $0x20] sm:$0xff]  }
 0x65a   :  { %v3230_v3 = vadd.f32 %v3229_v53, %v3228_v0  ;;  %v4619_v0 = vld [vmem:[%s5985_s4 + $0x28] sm:$0x7f]  }
 0x65b   :  { %v1680_v28 = vrot.slane %v1679_v1, 4 }
 0x65c   :  { %v3231_v29 = vrot.slane %v3230_v3, 4 }
 0x65d   :  { %v1681_v4 = vadd.f32 %v1680_v28, %v1679_v1  ;;  %v2771_v1 = vsel %vm404_vm0, %v4619_v0, 0 }
 0x65e   :  { %v3232_v7 = vadd.f32 %v3231_v29, %v3230_v3 }
 0x65f   :  { %v1682_v8 = vrot.slane %v1681_v4, 2 }
 0x660   :  { %v3233_v10 = vrot.slane %v3232_v7, 2 }
 0x661   :  { %v1683_v11 = vadd.f32 %v1682_v8, %v1681_v4 }
 0x662   :  { %v3234_v15 = vadd.f32 %v3233_v10, %v3232_v7 }
 0x663   :  { %v1684_v17 = vrot.slane %v1683_v11, 1 }
 0x664   :  { %v3235_v19 = vrot.slane %v3234_v15, 1 }
 0x665   :  { %v1685_v20 = vadd.f32 %v1684_v17, %v1683_v11  ;;  %v4620_v11 = vld [vmem:[#allocation11] sm:$0xff]  }
 0x666   :  { %v3236_v23 = vadd.f32 %v3235_v19, %v3234_v15  ;;  %v3834_v15 = vld [vmem:[#allocation10] ss:$0 sm:$0xff] }
 0x667   :  { %v1686_v24 = vmul.f32 0.015625, %v1685_v20 }
 0x668   :  { %v3237_v26 = vmul.f32 0.015625, %v3236_v23 }
 0x669   :  { %1688 = vst.msk [vmem:[#allocation3] sm:$0x1] %vm1687_vm13, %v1686_v24 }
 0x66a   :  { %3238 = vst.msk [vmem:[#allocation3 + $0x1] sm:$0x1] %vm1687_vm13, %v3237_v26 }
 0x702   :  { %v4306_v34 = vpop.f32.mrb[36].mxu1 }
 0x703   :  { %v2480_v35 = vpop.f32.mrb[37].mxu1 }
 0x704   :  { %v4307_v36 = vpop.f32.mrb[38].mxu1 }
 0x705   :  { %v5806_v12 = vpack.c.bf16 %v4307_v36, %v4306_v34  ;;  %v2483_v37 = vpop.f32.mrb[39].mxu1 }
 0x706   :  { %v5808_v40 = vpack.c.bf16 %v2483_v37, %v2480_v35 }
 0x707   :  { %v2531_v47 = vshll.u32 %v5806_v12, 16  ;;  %v2535_v31 = vshrl.u32 %v5806_v12, 16  ;;  %v2741_v28 = vrot.slane %v5806_v12, 1 }
 0x708   :  { %v2526_v41 = vshll.u32 %v5808_v40, 16  ;;  %v2524_v50 = vshrl.u32 %v5808_v40, 16  ;;  %v2740_v3 = vrot.slane %v5808_v40, 1 }
 0x709   :  { %v2533_v44 = vrot.slane %v2531_v47, 1 }
 0x70a   :  { %v4310_v49 = vpop.f32.mrb[40].mxu1  ;;  %v2528_v18 = vrot.slane %v2526_v41, 1  ;;  %v2742_v29 = vsel %vm404_vm0, %v2740_v3, %v2741_v28  ;;  %v4627_v3 = vld [vmem:[#allocation19 + $0x8] sm:$0x7f]  }
 0x70b   :  { %v2496_v56 = vpop.f32.mrb[41].mxu1  ;;  %v2537_v59 = vor.u32 %v2535_v31, %v2533_v44 }
 0x70c   :  { %v4311_v48 = vpop.f32.mrb[42].mxu1  ;;  %v2529_v2 = vor.u32 %v2528_v18, %v2524_v50 }
 0x70d   :  { %v5813_v46 = vpack.c.bf16 %v4311_v48, %v4310_v49  ;;  %v2499_v42 = vpop.f32.mrb[43].mxu1 }
 0x70e   :  { %v5815_v9 = vpack.c.bf16 %v2499_v42, %v2496_v56  ;;  %v2534_v39 = vsel %vm310_vm2, %v2529_v2, %v2533_v44 }
 0x70f   :  { %4316 = vmatprep.mubr.msk.bf16.mxu1 %vm1004_vm5, %v2534_v39  ;;  %v2547_v58 = vshll.u32 %v5813_v46, 16  ;;  %v2551_v53 = vshrl.u32 %v5813_v46, 16  ;;  %v2745_v7 = vrot.slane %v5813_v46, 1 }
 0x710   :  { %v2539_v57 = vshll.u32 %v5815_v9, 16  ;;  %v2543_v43 = vshrl.u32 %v5815_v9, 16  ;;  %v2743_v4 = vrot.slane %v5815_v9, 1 }
 0x711   :  { %v2549_v30 = vrot.slane %v2547_v58, 1 }
 0x712   :  { %v2541_v6 = vrot.slane %v2539_v57, 1  ;;  %v2744_v8 = vsel %vm404_vm0, %v2741_v28, %v2743_v4  ;;  %v2746_v10 = vsel %vm404_vm0, %v2743_v4, %v2745_v7  ;;  %v3262_v28 = vsel %vm404_vm0, %v4627_v3, 0  ;;  %v4629_v4 = vld [vmem:[%s5995_s14 + $0x8] sm:$0x7f]  }
 0x713   :  { %v2553_v63 = vor.u32 %v2551_v53, %v2549_v30 }
 0x714   :  { %v2542_v52 = vsel %vm310_vm2, %v2537_v59, %v2541_v6  ;;  %v2545_v55 = vor.u32 %v2543_v43, %v2541_v6  ;;  %v4622_v59 = vld [vmem:[#allocation13] sm:$0xff]   ;;  %v4621_v43 = vld [vmem:[#allocation11 + $0x8] ss:$0 sps:$4 sm:$0x33]  }
 0x715   :  { %4317 = vmatmul.mubr.msk.bf16.vlgmr.msra.gmra.mrb[44].mxu1 %vm1004_vm5, %v2542_v52  ;;  %v4624_v52 = vld [vmem:[#allocation13 + $0x10] sm:$0xff]  }
 0x716   :  { %4325 = vmatpush3.bf16.msra.mxu1 %v4616_v33  ;;  %v2550_v60 = vsel %vm310_vm2, %v2545_v55, %v2549_v30  ;;  %v4625_v55 = vld [vmem:[#allocation13 + $0x18] sm:$0x3f]   ;;  %vm4919_vm2 = vmmov 0  }
 0x717   :  { %4320 = vmatprep.mubr.msk.bf16.mxu1 %vm1004_vm5, %v2550_v60  ;;  %4547 = vmatprep.subr.msk.bf16.mxu1 %vm404_vm0, %v4617_v38  ;;  %v4623_v38 = vld [vmem:[#allocation13 + $0x8] sm:$0xff]   ;;  %v2988_v30 = vsel %vm1431_vm7, %v4625_v55, 0 }
 0x718   :  { %v4626_v60 = vld [vmem:[#allocation19] sm:$0xff]   ;;  %4426 = vmatprep.mubr.msk.bf16.mxu0 %vm4919_vm2, %v4918_v54 }
 0x71a   :  { %4327 = vmatpush3.bf16.msra.mxu1 %v2665_v61 }
 0x71b   :  { %4336 = vmatprep.subr.bf16.mxu1 %v4618_v62 }
 0x71d   :  { %4321 = vmatmul.mubr.msk.bf16.gmra.mrb[48].mxu1 %vm1004_vm5, %v2553_v63 }
 0x71e   :  { %4328 = vmatprep.mubr.msk.bf16.mxu1 %vm1004_vm5, %v5808_v40 }
 0x725   :  { %4329 = vmatmul.mubr.msk.bf16.vlgmr.msra.gmra.mrb[44].mxu1 %vm1004_vm5, %v5806_v12 }
 0x726   :  { %4332 = vmatprep.mubr.msk.bf16.mxu1 %vm1004_vm5, %v5815_v9  ;;  %4337 = vmatpush3.bf16.msra.mxu1 %v4618_v62 }
 0x727   :  { %4548 = vmatprep.subr.msk.bf16.mxu1 %vm404_vm0, %v4619_v0 }
 0x72a   :  { %4339 = vmatpush3.bf16.msra.mxu1 %v2771_v1 }
 0x72d   :  { %4333 = vmatmul.mubr.msk.bf16.gmra.mrb[48].mxu1 %vm1004_vm5, %v5813_v46 }
 0x72e   :  { %4340 = vmatprep.mubr.msk.bf16.mxu1 %vm1004_vm5, %v2742_v29  ;;  %v4628_v29 = vld [vmem:[%s5995_s14] sm:$0xff]  }
 0x735   :  { %4341 = vmatmul.mubr.msk.bf16.vlgmr.msra.gmra.mrb[44].mxu1 %vm1004_vm5, %v2744_v8 }
 0x736   :  { %4344 = vmatprep.mubr.msk.bf16.mxu1 %vm1004_vm5, %v2746_v10  ;;  %v4633_v10 = vld [vmem:[%s5994_s13 + $0x18] sm:$0xff]  }
 0x73d   :  { %4345 = vmatmul.mubr.msk.bf16.gmra.mrb[48].mxu1 %vm1004_vm5, %v2745_v7  ;;  %v3385_v7 = vld [vmem:[#allocation3] sm:$0x3] }
 0x73e   :  { %4356 = vmatprep.mubr.msk.bf16.mxu1 %vm1325_vm6, %v4620_v11  ;;  %v3386_v8 = vpack.c.bf16 %v3385_v7, %v3385_v7  ;;  %v4634_v11 = vld [vmem:[%s5994_s13 + $0x20] sm:$0xff]  }
 0x808   :  { %v4342_v17 = vpop.f32.mrb[44].mxu1 }
 0x809   :  { %v2855_v19 = vadd.f32 %v4342_v17, %v3834_v15  ;;  %v2807_v20 = vpop.f32.mrb[45].mxu1  ;;  %v4636_v17 = vld [vmem:[%s5994_s13 + $0x30] sm:$0xff]  }
 0x80a   :  { %v2853_v23 = vadd.f32 %v3834_v15, %v2807_v20  ;;  %v4343_v24 = vpop.f32.mrb[46].mxu1 }
 0x80b   :  { %v2856_v26 = vadd.f32 %v4343_v24, %v3834_v15  ;;  %v2810_v27 = vpop.f32.mrb[47].mxu1  ;;  %v2863_v32 = vmax.f32 %v2855_v19, 0.0  ;;  %v4637_v19 = vld [vmem:[%s5994_s13 + $0x38] ss:$0 sps:$4 sm:$0xff]   ;;  %v4639_v24 = vld [vmem:[%s5996_s15 + $0x8] sm:$0xff]  }
 0x80c   :  { %v2854_v21 = vadd.f32 %v3834_v15, %v2810_v27  ;;  %v2861_v34 = vmax.f32 %v2853_v23, 0.0  ;;  %v4638_v23 = vld [vmem:[%s5996_s15] sm:$0xff]   ;;  %v4641_v27 = vld [vmem:[%s5996_s15 + $0x18] sm:$0x3f]  }
 0x80d   :  { %v2864_v33 = vmax.f32 %v2856_v26, 0.0  ;;  %v4640_v26 = vld [vmem:[%s5996_s15 + $0x10] sm:$0xff]  }
 0x80e   :  { %v2862_v35 = vmax.f32 %v2854_v21, 0.0  ;;  %v3577_v21 = vsel %vm1431_vm7, %v4641_v27, 0 }
 0x80f   :  { %v2873_v36 = vpack.c.bf16 %v2864_v33, %v2863_v32  ;;  %v3839_v32 = vld [vmem:[#allocation14] ss:$0 sm:$0xff] }
 0x810   :  { %v2872_v37 = vpack.c.bf16 %v2862_v35, %v2861_v34  ;;  %v4346_v41 = vpop.f32.mrb[48].mxu1 }
 0x811   :  { %v2859_v47 = vadd.f32 %v4346_v41, %v3834_v15  ;;  %v2823_v49 = vpop.f32.mrb[49].mxu1 }
 0x812   :  { %v2857_v50 = vadd.f32 %v3834_v15, %v2823_v49  ;;  %v4347_v18 = vpop.f32.mrb[50].mxu1  ;;  %4348 = vmatprep.subr.bf16.mxu1 %v2872_v37 }
 0x813   :  { %v2860_v56 = vadd.f32 %v4347_v18, %v3834_v15  ;;  %v2826_v48 = vpop.f32.mrb[51].mxu1  ;;  %4349 = vmatpush3.bf16.msra.mxu1 %v2872_v37  ;;  %v2867_v44 = vmax.f32 %v2859_v47, 0.0 }
 0x814   :  { %v2858_v2 = vadd.f32 %v3834_v15, %v2826_v48  ;;  %4350 = vmatprep.subr.bf16.mxu1 %v2873_v36  ;;  %v2865_v39 = vmax.f32 %v2857_v50, 0.0  ;;  %v4635_v15 = vld [vmem:[%s5994_s13 + $0x28] sm:$0xff]  }
 0x815   :  { %v2868_v42 = vmax.f32 %v2860_v56, 0.0  ;;  %v3856_v56 = vld [vmem:[#allocation20] ss:$0 sm:$0xff] }
 0x816   :  { %v2866_v57 = vmax.f32 %v2858_v2, 0.0 }
 0x817   :  { %v2875_v31 = vpack.c.bf16 %v2868_v42, %v2867_v44  ;;  %4351 = vmatpush3.bf16.msra.mxu1 %v2873_v36 }
 0x818   :  { %v2874_v58 = vpack.c.bf16 %v2866_v57, %v2865_v39 }
 0x819   :  { %v2891_v6 = vsel %vm1332_vm8, %v2875_v31, 0 }
 0x81a   :  { %4352 = vmatprep.subr.bf16.mxu1 %v2874_v58 }
 0x81b   :  { %4353 = vmatpush3.bf16.msra.mxu1 %v2874_v58 }
 0x81c   :  { %4549 = vmatprep.subr.msk.bf16.mxu1 %vm1332_vm8, %v2875_v31 }
 0x81f   :  { %4355 = vmatpush3.bf16.msra.mxu1 %v2891_v6 }
 0x820   :  { %4360 = vmatprep.subr.bf16.mxu1 %v4622_v59 }
 0x822   :  { %4357 = vmatmul.mubr.msk.bf16.vlgmr.msra.gmra.mrb[52].mxu1 %vm1325_vm6, %v4621_v43 }
 0x823   :  { %4361 = vmatpush3.bf16.msra.mxu1 %v4622_v59 }
 0x824   :  { %4362 = vmatprep.subr.bf16.mxu1 %v4623_v38 }
 0x827   :  { %4363 = vmatpush3.bf16.msra.mxu1 %v4623_v38 }
 0x828   :  { %4364 = vmatprep.subr.bf16.mxu1 %v4624_v52 }
 0x82b   :  { %4365 = vmatpush3.bf16.msra.mxu1 %v4624_v52 }
 0x82c   :  { %4550 = vmatprep.subr.msk.bf16.mxu1 %vm1431_vm7, %v4625_v55 }
 0x82f   :  { %4367 = vmatpush3.bf16.msra.mxu1 %v2988_v30 }
 0x830   :  { %4390 = vmatprep.subr.bf16.mxu1 %v4626_v60 }
 0x8f5   :  { %v4358_v61 = vpop.f32.mrb[52].mxu1 }
 0x8f6   :  { %v2927_v62 = vpop.f32.mrb[53].mxu1  ;;  %v2942_v1 = vpack.c.bf16 %v4358_v61, %v4358_v61 }
 0x8f7   :  { %v4359_v53 = vpop.f32.mrb[54].mxu1 }
 0x8f8   :  { %v2930_v63 = vpop.f32.mrb[55].mxu1 }
 0x8f9   :  { %v2941_v0 = vpack.c.bf16 %v2930_v63, %v2927_v62 }
 0x8fb   :  { %4368 = vmatprep.mubr.msk.bf16.mxu1 %vm1424_vm9, %v2941_v0 }
 0x8fc   :  { %4369 = vmatmul.mubr.msk.bf16.vlgmr.msra.gmra.mrb[56].mxu1 %vm1424_vm9, %v2942_v1 }
 0x8fd   :  { %4391 = vmatpush3.bf16.msra.mxu1 %v4626_v60  ;;  %4394 = vmatprep.mubr.msk.bf16.mxu1 %vm1004_vm5, %v5808_v40  ;;  %v3406_v40 = vsel %vm404_vm0, %v4629_v4, 0 }
 0x8fe   :  { %4551 = vmatprep.subr.msk.bf16.mxu1 %vm404_vm0, %v4627_v3  ;;  %vm3496_vm0 = vcmask 1043456  }
 0x8ff   :  { %v3498_v20 = vsel %vm3496_vm0, %v4637_v19, 0 }
 0x901   :  { %4393 = vmatpush3.bf16.msra.mxu1 %v3262_v28 }
 0x902   :  { %4402 = vmatprep.subr.bf16.mxu1 %v4918_v54 }
 0x904   :  { %4395 = vmatmul.mubr.msk.bf16.vlgmr.msra.gmra.mrb[60].mxu1 %vm1004_vm5, %v5806_v12  ;;  %v4630_v12 = vld [vmem:[%s5994_s13] sm:$0xff]  }
 0x905   :  { %4398 = vmatprep.mubr.msk.bf16.mxu1 %vm1004_vm5, %v5815_v9  ;;  %4403 = vmatpush3.bf16.msra.mxu1 %v4628_v29  ;;  %v4632_v9 = vld [vmem:[%s5994_s13 + $0x10] sm:$0xff]  }
 0x906   :  { %4404 = vmatprep.subr.bf16.mxu1 %v4918_v54  ;;  %4411 = vmatpush3.bf16.msra.mxu0 %v4630_v12 }
 0x907   :  { %4412 = vmatprep.subr.bf16.mxu0 %v4918_v54 }
 0x909   :  { %4405 = vmatpush3.bf16.msra.mxu1 %v3406_v40 }
 0x90a   :  { %4430 = vmatprep.subr.bf16.mxu1 %v4918_v54 }
 0x90c   :  { %4399 = vmatmul.mubr.msk.bf16.gmra.mrb[64].mxu1 %vm1004_vm5, %v5813_v46  ;;  %v4631_v46 = vld [vmem:[%s5994_s13 + $0x8] sm:$0xff]  }
 0x90d   :  { %4406 = vmatprep.mubr.msk.bf16.mxu1 %vm4919_vm2, %v4918_v54  ;;  %4413 = vmatpush3.bf16.msra.mxu0 %v4631_v46 }
 0x90e   :  { %4414 = vmatprep.subr.bf16.mxu0 %v4918_v54 }
 0x911   :  { %4415 = vmatpush3.bf16.msra.mxu0 %v4632_v9 }
 0x912   :  { %4416 = vmatprep.subr.bf16.mxu0 %v4918_v54 }
 0x914   :  { %4407 = vmatmul.mubr.msk.bf16.vlgmr.msra.gmra.mrb[68].mxu1 %vm1004_vm5, %v3386_v8  ;;  %vm6028_vm5 = vcmask 483328  }
 0x915   :  { %4438 = vmatprep.mubr.msk.bf16.mxu1 %vm4919_vm2, %v4918_v54  ;;  %4417 = vmatpush3.bf16.msra.mxu0 %v4633_v10 }
 0x916   :  { %4418 = vmatprep.subr.bf16.mxu0 %v4918_v54  ;;  %4431 = vmatpush3.bf16.msra.mxu1 %v4638_v23 }
 0x917   :  { %4432 = vmatprep.subr.bf16.mxu1 %v4918_v54 }
 0x919   :  { %4419 = vmatpush3.bf16.msra.mxu0 %v4634_v11 }
 0x91a   :  { %4420 = vmatprep.subr.bf16.mxu0 %v4918_v54  ;;  %4433 = vmatpush3.bf16.msra.mxu1 %v4639_v24 }
 0x91b   :  { %4434 = vmatprep.subr.bf16.mxu1 %v4918_v54 }
 0x91d   :  { %4421 = vmatpush3.bf16.msra.mxu0 %v4635_v15 }
 0x91e   :  { %4422 = vmatprep.subr.bf16.mxu0 %v4918_v54  ;;  %4435 = vmatpush3.bf16.msra.mxu1 %v4640_v26 }
 0x91f   :  { %4436 = vmatprep.subr.bf16.mxu1 %v4918_v54 }
 0x921   :  { %4423 = vmatpush3.bf16.msra.mxu0 %v4636_v17 }
 0x922   :  { %4424 = vmatprep.subr.bf16.mxu0 %v4918_v54  ;;  %4437 = vmatpush3.bf16.msra.mxu1 %v3577_v21 }
 0x925   :  { %4425 = vmatpush3.bf16.msra.mxu0 %v3498_v20 }
 0x9cf   :  { %v4370_v33 = vpop.f32.mrb[56].mxu1 }
 0x9d0   :  { %v3024_v34 = vpop.f32.mrb[57].mxu1  ;;  %v3033_v35 = vadd.f32 %v4370_v33, %v3839_v32 }
 0x9d1   :  { %v3025_v36 = vadd.f32 %v3839_v32, %v3024_v34  ;;  %v4371_v37 = vpop.f32.mrb[58].mxu1 }
 0x9d2   :  { %v3027_v41 = vpop.f32.mrb[59].mxu1  ;;  %v3040_v50 = vmax.f32 %v3033_v35, 0.0 }
 0x9d3   :  { %v3038_v47 = vmax.f32 %v3025_v36, 0.0  ;;  %v3028_v49 = vadd.f32 %v3839_v32, %v3027_v41 }
 0x9d4   :  { %v3044_v57 = vsel %vm1490_vm12, %v3040_v50, 0.0 }
 0x9d5   :  { %v3039_v18 = vmax.f32 %v3028_v49, 0.0  ;;  %v3041_v48 = vsel %vm1486_vm10, %v3038_v47, 0.0 }
 0x9d7   :  { %v3042_v2 = vsel %vm1486_vm10, %v3039_v18, 0.0  ;;  %v4396_v54 = vpop.f32.mrb[60].mxu1 }
 0x9d8   :  { %v3043_v44 = vadd.f32 %v3042_v2, %v3041_v48  ;;  %v3307_v42 = vadd.f32 %v4396_v54, %v3856_v56  ;;  %v3298_v39 = vpop.f32.mrb[61].mxu1 }
 0x9d9   :  { %v3299_v31 = vadd.f32 %v3856_v56, %v3298_v39  ;;  %v4397_v58 = vpop.f32.mrb[62].mxu1 }
 0x9da   :  { %v3045_v59 = vadd.f32 %v3044_v57, %v3043_v44  ;;  %v3310_v6 = vadd.f32 %v4397_v58, %v3856_v56  ;;  %v3301_v43 = vpop.f32.mrb[63].mxu1  ;;  %v3331_v38 = vmax.f32 %v3307_v42, 0.0 }
 0x9db   :  { %v3329_v52 = vmax.f32 %v3299_v31, 0.0  ;;  %v3302_v55 = vadd.f32 %v3856_v56, %v3301_v43 }
 0x9dc   :  { %v3046_v30 = vrot.slane %v3045_v59, 4  ;;  %v3332_v61 = vmax.f32 %v3310_v6, 0.0  ;;  %v3339_v63 = vmul.f32 %v3331_v38, %v5557_v5 }
 0x9dd   :  { %v3337_v60 = vmul.f32 %v3329_v52, %v5545_v25  ;;  %v3330_v62 = vmax.f32 %v3302_v55, 0.0 }
 0x9de   :  { %v3047_v53 = vadd.f32 %v3046_v30, %v3045_v59  ;;  %v3340_v40 = vmul.f32 %v3332_v61, %v5566_v51  ;;  %v3348_v5 = vsel %vm1424_vm9, %v3339_v63, 0.0 }
 0x9df   :  { %v3338_v0 = vmul.f32 %v3330_v62, %v5560_v45  ;;  %v4400_v1 = vpop.f32.mrb[64].mxu1  ;;  %v3345_v4 = vsel %vm1424_vm9, %v3337_v60, 0.0  ;;  %v3880_v60 = vld [vmem:[%s5997_s16] ss:$0 sm:$0xff] }
 0x9e0   :  { %v3048_v3 = vrot.slane %v3047_v53, 2  ;;  %v3323_v28 = vadd.f32 %v4400_v1, %v3856_v56  ;;  %v3314_v29 = vpop.f32.mrb[65].mxu1  ;;  %v3350_v20 = vsel %vm1424_vm9, %v3340_v40, 0.0 }
 0x9e1   :  { %v3346_v7 = vsel %vm1424_vm9, %v3338_v0, 0.0  ;;  %v3315_v8 = vadd.f32 %v3856_v56, %v3314_v29  ;;  %v4401_v12 = vpop.f32.mrb[66].mxu1 }
 0x9e2   :  { %v3049_v25 = vadd.f32 %v3048_v3, %v3047_v53  ;;  %v3347_v46 = vadd.f32 %v3346_v7, %v3345_v4  ;;  %v3326_v9 = vadd.f32 %v4401_v12, %v3856_v56  ;;  %v3317_v10 = vpop.f32.mrb[67].mxu1  ;;  %v3335_v11 = vmax.f32 %v3323_v28, 0.0 }
 0x9e3   :  { %v3333_v45 = vmax.f32 %v3315_v8, 0.0  ;;  %v3318_v15 = vadd.f32 %v3856_v56, %v3317_v10 }
 0x9e4   :  { %v3050_v17 = vrot.slane %v3049_v25, 1  ;;  %v3349_v19 = vadd.f32 %v3348_v5, %v3347_v46  ;;  %v3336_v51 = vmax.f32 %v3326_v9, 0.0  ;;  %v3343_v21 = vmul.f32 %v3335_v11, %v5592_v13 }
 0x9e5   :  { %v3341_v23 = vmul.f32 %v3333_v45, %v5575_v16  ;;  %v3334_v24 = vmax.f32 %v3318_v15, 0.0 }
 0x9e6   :  { %v3051_v26 = vadd.f32 %v3050_v17, %v3049_v25  ;;  %v3351_v27 = vadd.f32 %v3350_v20, %v3349_v19  ;;  %v3344_v41 = vmul.f32 %v3336_v51, %v5604_v22  ;;  %v3356_v18 = vsel %vm1424_vm9, %v3343_v21, 0.0 }
 0x9e7   :  { %v3352_v32 = vsel %vm1424_vm9, %v3341_v23, 0.0  ;;  %v3342_v33 = vmul.f32 %v3334_v24, %v5597_v14  ;;  %v3442_v34 = vpop.f32.mrb[68].mxu1 }
 0x9e8   :  { %v3052_v35 = vmul.f32 0.05, %v3051_v26  ;;  %v3353_v36 = vadd.f32 %v3352_v32, %v3351_v27  ;;  %v4408_v37 = vpop.f32.mrb[69].mxu1  ;;  %v3358_v56 = vsel %vm1808_vm15, %v3344_v41, 0.0 }
 0x9e9   :  { %v3354_v47 = vsel %vm1424_vm9, %v3342_v33, 0.0  ;;  %v3445_v49 = vpop.f32.mrb[70].mxu1 }
 0x9ea   :  { %3053 = vst.msk [vmem:[#allocation2 + $0x1] sm:$0x1] %vm1501_vm14, %v3052_v35  ;;  %v3355_v16 = vadd.f32 %v3354_v47, %v3353_v36  ;;  %v4409_v50 = vpop.f32.mrb[71].mxu1 }
 0x9ec   :  { %v3357_v13 = vadd.f32 %v3356_v18, %v3355_v16 }
 0x9ee   :  { %v3359_v48 = vadd.f32 %v3358_v56, %v3357_v13 }
 0x9f0   :  { %v3360_v14 = vrot.slane %v3359_v48, 4 }
 0x9f1   :  { %v3368_v2 = vld [vmem:[#allocation2] sm:$0x3] }
 0x9f2   :  { %v3361_v54 = vadd.f32 %v3360_v14, %v3359_v48  ;;  %v3369_v44 = vpack.c.bf16 %v3368_v2, %v3368_v2 }
 0x9f4   :  { %v3362_v42 = vrot.slane %v3361_v54, 2  ;;  %4427 = vmatmul.mubr.msk.bf16.vlgmr.msra.gmra.mrb[60].mxu0 %vm1486_vm10, %v3369_v44 }
 0x9f6   :  { %v3363_v22 = vadd.f32 %v3362_v42, %v3361_v54 }
 0x9f8   :  { %v3364_v39 = vrot.slane %v3363_v22, 1 }
 0x9fa   :  { %v3365_v57 = vadd.f32 %v3364_v39, %v3363_v22 }
 0x9fc   :  { %v3366_v31 = vmul.f32 0.033333335, %v3365_v57 }
 0x9fe   :  { %3367 = vst.msk [vmem:[#allocation4 + $0x1] sm:$0x1] %vm6028_vm5, %v3366_v31 }
 0xa05   :  { %v3540_v58 = vld [vmem:[#allocation4] sm:$0x3] }
 0xa06   :  { %v3541_v59 = vpack.c.bf16 %v3540_v58, %v3540_v58 }
 0xa08   :  { %4439 = vmatmul.mubr.msk.bf16.vlgmr.msra.gmra.mrb[72].mxu1 %vm1424_vm9, %v3541_v59 }
 0xac7   :  { %v3534_v6 = vpop.f32.mrb[60].mxu0 }
 0xac8   :  { %v3535_v43 = vadd.f32 %v3534_v6, %v3442_v34  ;;  %v4428_v38 = vpop.f32.mrb[61].mxu0 }
 0xac9   :  { %v3537_v52 = vpop.f32.mrb[62].mxu0 }
 0xaca   :  { %v4429_v55 = vpop.f32.mrb[63].mxu0 }
 0xadb   :  { %v3613_v30 = vpop.f32.mrb[72].mxu1 }
 0xadc   :  { %v3619_v61 = vadd.f32 %v3613_v30, %v3535_v43  ;;  %v4440_v62 = vpop.f32.mrb[73].mxu1 }
 0xadd   :  { %v3616_v53 = vpop.f32.mrb[74].mxu1 }
 0xade   :  { %v3627_v63 = vadd.f32 %v3880_v60, %v3619_v61  ;;  %v4441_v0 = vpop.f32.mrb[75].mxu1 }
 0xae0   :  { %3628 = vst [vmem:[#allocation22] sm:$0x3] %v3627_v63 }
 0xae1   :  { %4880 = shalt.err (!%p4877_p0)
}
 0xae2   :  { %s4881_s16 = scalar_lea.hbm %s5998_s17, 32 }
 0xae3   :  { %p4882_p1 = scmp.ne.s32.totalorder %s5998_s17, %s4881_s16  ;;  %p4885_p2 = scmp.lt.u32.totalorder %s4881_s16, %s5998_s17 }
 0xae5   :  { %p4887_p3 = pnand %p4885_p2, %p4882_p1 }
 0xae7   :  { %4890 = shalt.err (!%p4887_p3)
}
 0xae8   :  { %3638 = dma.vmem_to_hbm [thread:$0]  %s3636_s7, 32, %s5998_s17, [#allocation7]  }
 0xae9   :  { %4903 = dma.done.wait [#allocation7], 32  }
 0xaea   :  { %4904 = vsyncadd [#allocation7], 4294967264 }
 0xaeb   :  { %3642 = vsyncpa [#allocation6], 1 }
 0xaec   :  { %3643 = vsyncpa [#allocation9], 1 }
 0xaed   :  { %3644 = vsyncpa [#allocation12], 1 }
 0xaee   :  { %3645 = vsyncpa [#allocation15], 1 }
 0xaef   :  { %3646 = vsyncpa [#allocation18], 1 }
 0xaf0   :  { %3647 = vsyncpa [#allocation21], 1 }
 0xaf1   :  { %3648 = vsyncpa [#allocation7], 1 }

</bundles_post_ra>
